<compile_context>
chip_gen: v7x
topology: tpu7x:2x2x1
jax: 0.10.0
libtpu: 0.0.40
codegen_flags: <defaults>
</compile_context>

<pallas_src>
import jax
import jax.numpy as jnp
from jax.experimental import pallas as pl
from jax.experimental.pallas import tpu as pltpu

# ---- model hyperparameters (small, consistent with the module) -------------
LATENT_DIM = 32
CHANNELS = 1
IMG_SIZE = 8
IMG_FLAT = CHANNELS * IMG_SIZE * IMG_SIZE   # 64
IMG_FLAT_PAD = 128                          # lane-dense padded output width
BATCH = 8
BN_EPS = 0.8
LRELU_SLOPE = 0.2
HIDDEN = (128, 256, 512, 1024)

# Packed vector slab layout (rows of an (8, 1024) f32 array):
#   row 0: b1   (128)      row 1: gamma2 (256)   row 2: beta2 (256)
#   row 3: gamma3 (512)    row 4: beta3  (512)
#   row 5: gamma4 (1024)   row 6: beta4  (1024)
#   row 7: b5   (128, padded from 64)
VEC_ROWS = 8
VEC_COLS = 1024


# ---------------------------------------------------------------------------
# Fused forward kernel: whole MLP in VMEM, single grid cell.
# ---------------------------------------------------------------------------
def generator_kernel(z_ref, w1_ref, w2_ref, w3_ref, w4_ref, w5_ref,
                     vec_ref, out_ref):
    vec = vec_ref[...]                       # (8, 1024) f32 packed vectors

    def row(i, n):
        return vec[i:i + 1, :n]              # (1, n) f32

    def linear(x, w_ref):
        # bf16 x bf16 inputs, f32 accumulation on the MXU
        return jnp.dot(x.astype(jnp.bfloat16), w_ref[...],
                       preferred_element_type=jnp.float32)

    def leaky_relu(x):
        return jnp.maximum(x, LRELU_SLOPE * x)

    def batch_norm(x, gamma, beta):
        # training-mode BN: per-batch mean, biased variance, eps = 0.8
        mean = jnp.mean(x, axis=0, keepdims=True)
        centered = x - mean
        var = jnp.mean(centered * centered, axis=0, keepdims=True)
        inv = jax.lax.rsqrt(var + BN_EPS)
        return centered * inv * gamma + beta

    x = z_ref[...].astype(jnp.float32)

    h = leaky_relu(linear(x, w1_ref) + row(0, 128))                          # (B, 128)
    h = leaky_relu(batch_norm(linear(h, w2_ref), row(1, 256), row(2, 256)))  # (B, 256)
    h = leaky_relu(batch_norm(linear(h, w3_ref), row(3, 512), row(4, 512)))  # (B, 512)
    h = leaky_relu(batch_norm(linear(h, w4_ref), row(5, 1024), row(6, 1024)))  # (B, 1024)
    h = jnp.tanh(linear(h, w5_ref) + row(7, IMG_FLAT_PAD))                   # (B, 128)

    out_ref[...] = h.astype(out_ref.dtype)


def generator_forward(z, params):
    """z: (B, LATENT_DIM) float32 -> img: (B, C, H, W) float32."""
    weights, vec_slab = params
    B = z.shape[0]

    dims_in = (LATENT_DIM,) + HIDDEN
    dims_out = HIDDEN + (IMG_FLAT_PAD,)
    flops = 2 * B * sum(a * b for a, b in zip(dims_in, dims_out))
    transcendentals = B * IMG_FLAT_PAD + sum(HIDDEN[1:])   # tanh + BN rsqrt
    bytes_accessed = (
        z.size * z.dtype.itemsize
        + sum(w.size * w.dtype.itemsize for w in weights)
        + vec_slab.size * vec_slab.dtype.itemsize
        + B * IMG_FLAT_PAD * 4)

    n_inputs = 1 + len(weights) + 1   # z, 5 weights, packed vector slab
    out = pl.pallas_call(
        generator_kernel,
        out_shape=jax.ShapeDtypeStruct((B, IMG_FLAT_PAD), jnp.float32),
        in_specs=[pl.BlockSpec(memory_space=pltpu.VMEM)] * n_inputs,
        out_specs=pl.BlockSpec(memory_space=pltpu.VMEM),
        compiler_params=pltpu.CompilerParams(vmem_limit_bytes=16 << 20),
        cost_estimate=pl.CostEstimate(
            flops=flops,
            transcendentals=transcendentals,
            bytes_accessed=bytes_accessed),
    )(z, *weights, vec_slab)

    # Slice the lane-padding off, then reshape to NCHW.
    return out[:, :IMG_FLAT].reshape(B, CHANNELS, IMG_SIZE, IMG_SIZE)


# ---------------------------------------------------------------------------
# Deterministic parameter initialization (PyTorch-default-style uniform for
# Linear; gamma=1 / beta=0 for BatchNorm).  Weights stored (in, out) bf16;
# all per-feature vectors packed into one (8, 1024) f32 slab.
# ---------------------------------------------------------------------------
def init_params(key):
    dims = (LATENT_DIM,) + HIDDEN + (IMG_FLAT,)
    weights = []
    slab = jnp.zeros((VEC_ROWS, VEC_COLS), jnp.float32)

    for i in range(len(dims) - 1):
        fan_in, fan_out = dims[i], dims[i + 1]
        key, kw, kb = jax.random.split(key, 3)
        bound = 1.0 / (fan_in ** 0.5)
        w = jax.random.uniform(kw, (fan_in, fan_out), jnp.float32, -bound, bound)
        b = jax.random.uniform(kb, (fan_out,), jnp.float32, -bound, bound)

        if i == 0:
            slab = slab.at[0, :fan_out].set(b)                 # b1
        elif i == len(dims) - 2:
            # last layer: pad output columns to 128 for a lane-dense store
            w = jnp.pad(w, ((0, 0), (0, IMG_FLAT_PAD - fan_out)))
            slab = slab.at[7, :fan_out].set(b)                 # b5 (rest zero)
        else:
            # Pre-BN bias dropped (cancelled exactly by BN mean subtraction).
            slab = slab.at[2 * i - 1, :fan_out].set(1.0)       # gamma = 1
            # beta row (2*i) stays zero

        weights.append(w.astype(jnp.bfloat16))

    return weights, slab


if __name__ == "__main__":
    key = jax.random.PRNGKey(0)
    key, kz = jax.random.split(key)

    params = init_params(key)
    z = jax.random.normal(kz, (BATCH, LATENT_DIM), jnp.float32)

    img = generator_forward(z, params)
    img = jax.block_until_ready(img)

    assert img.shape == (BATCH, CHANNELS, IMG_SIZE, IMG_SIZE), img.shape
    assert bool(jnp.all(jnp.isfinite(img)))
    # Tanh output range sanity check
    assert bool(jnp.all(jnp.abs(img) <= 1.0 + 1e-6))

    print("KERNEL_OK")
</pallas_src>

<mosaic_0001>
module attributes {stable_mosaic.version = 11 : i64} {
  func.func @generator_kernel(%arg0: memref<8x32xf32, #tpu.memory_space<vmem>>, %arg1: memref<32x128xbf16, #tpu.memory_space<vmem>>, %arg2: memref<128x256xbf16, #tpu.memory_space<vmem>>, %arg3: memref<256x512xbf16, #tpu.memory_space<vmem>>, %arg4: memref<512x1024xbf16, #tpu.memory_space<vmem>>, %arg5: memref<1024x128xbf16, #tpu.memory_space<vmem>>, %arg6: memref<8x1024xf32, #tpu.memory_space<vmem>>, %arg7: memref<8x128xf32, #tpu.memory_space<vmem>>) attributes {dimension_semantics = [], scalar_prefetch = 0 : i64, scratch_operands = 0 : i64, tpu.core_type = #tpu.core_type<tc>} {
    %c0 = arith.constant 0 : index
    %c0_0 = arith.constant 0 : index
    %0 = vector.load %arg6[%c0, %c0_0] : memref<8x1024xf32, #tpu.memory_space<vmem>>, vector<8x1024xf32>
    %c0_1 = arith.constant 0 : index
    %c0_2 = arith.constant 0 : index
    %1 = vector.load %arg0[%c0_1, %c0_2] : memref<8x32xf32, #tpu.memory_space<vmem>>, vector<8x32xf32>
    %2 = arith.truncf %1 : vector<8x32xf32> to vector<8x32xbf16>
    %c0_3 = arith.constant 0 : index
    %c0_4 = arith.constant 0 : index
    %3 = vector.load %arg1[%c0_3, %c0_4] : memref<32x128xbf16, #tpu.memory_space<vmem>>, vector<32x128xbf16>
    %cst = arith.constant dense<0.000000e+00> : vector<8x128xf32>
    %4 = tpu.matmul %2, %3, %cst {dimension_numbers = #tpu.dot_dimension_numbers<[1], [0], [0], [1], [0, 0, 1, 1], [], []>} : vector<8x32xbf16>, vector<32x128xbf16>, vector<8x128xf32> -> vector<8x128xf32>
    %5 = vector.extract_strided_slice %0 {offsets = [0, 0], sizes = [1, 128], strides = [1, 1]} : vector<8x1024xf32> to vector<1x128xf32>
    %6 = vector.broadcast %5 : vector<1x128xf32> to vector<8x128xf32>
    %7 = arith.addf %4, %6 : vector<8x128xf32>
    %cst_5 = arith.constant 2.000000e-01 : f32
    %8 = vector.broadcast %cst_5 : f32 to vector<8x128xf32>
    %9 = arith.mulf %8, %7 : vector<8x128xf32>
    %10 = arith.maximumf %7, %9 : vector<8x128xf32>
    %11 = arith.truncf %10 : vector<8x128xf32> to vector<8x128xbf16>
    %c0_6 = arith.constant 0 : index
    %c0_7 = arith.constant 0 : index
    %12 = vector.load %arg2[%c0_6, %c0_7] : memref<128x256xbf16, #tpu.memory_space<vmem>>, vector<128x256xbf16>
    %cst_8 = arith.constant dense<0.000000e+00> : vector<8x256xf32>
    %13 = tpu.matmul %11, %12, %cst_8 {dimension_numbers = #tpu.dot_dimension_numbers<[1], [0], [0], [1], [0, 0, 1, 1], [], []>} : vector<8x128xbf16>, vector<128x256xbf16>, vector<8x256xf32> -> vector<8x256xf32>
    %14 = vector.extract_strided_slice %0 {offsets = [1, 0], sizes = [1, 256], strides = [1, 1]} : vector<8x1024xf32> to vector<1x256xf32>
    %15 = vector.extract_strided_slice %0 {offsets = [2, 0], sizes = [1, 256], strides = [1, 1]} : vector<8x1024xf32> to vector<1x256xf32>
    %cst_9 = arith.constant dense<0.000000e+00> : vector<256xf32>
    %16 = vector.multi_reduction <add>, %13, %cst_9 [0] : vector<8x256xf32> to vector<256xf32>
    %17 = vector.shape_cast %16 : vector<256xf32> to vector<1x256xf32>
    %cst_10 = arith.constant 8.000000e+00 : f32
    %18 = vector.broadcast %cst_10 : f32 to vector<1x256xf32>
    %19 = arith.divf %17, %18 : vector<1x256xf32>
    %20 = vector.broadcast %19 : vector<1x256xf32> to vector<8x256xf32>
    %21 = arith.subf %13, %20 : vector<8x256xf32>
    %22 = arith.mulf %21, %21 : vector<8x256xf32>
    %cst_11 = arith.constant dense<0.000000e+00> : vector<256xf32>
    %23 = vector.multi_reduction <add>, %22, %cst_11 [0] : vector<8x256xf32> to vector<256xf32>
    %24 = vector.shape_cast %23 : vector<256xf32> to vector<1x256xf32>
    %cst_12 = arith.constant 8.000000e+00 : f32
    %25 = vector.broadcast %cst_12 : f32 to vector<1x256xf32>
    %26 = arith.divf %24, %25 : vector<1x256xf32>
    %cst_13 = arith.constant 8.000000e-01 : f32
    %27 = vector.broadcast %cst_13 : f32 to vector<1x256xf32>
    %28 = arith.addf %26, %27 : vector<1x256xf32>
    %29 = math.rsqrt %28 : vector<1x256xf32>
    %30 = vector.broadcast %29 : vector<1x256xf32> to vector<8x256xf32>
    %31 = arith.mulf %21, %30 : vector<8x256xf32>
    %32 = vector.broadcast %14 : vector<1x256xf32> to vector<8x256xf32>
    %33 = arith.mulf %31, %32 : vector<8x256xf32>
    %34 = vector.broadcast %15 : vector<1x256xf32> to vector<8x256xf32>
    %35 = arith.addf %33, %34 : vector<8x256xf32>
    %cst_14 = arith.constant 2.000000e-01 : f32
    %36 = vector.broadcast %cst_14 : f32 to vector<8x256xf32>
    %37 = arith.mulf %36, %35 : vector<8x256xf32>
    %38 = arith.maximumf %35, %37 : vector<8x256xf32>
    %39 = arith.truncf %38 : vector<8x256xf32> to vector<8x256xbf16>
    %c0_15 = arith.constant 0 : index
    %c0_16 = arith.constant 0 : index
    %40 = vector.load %arg3[%c0_15, %c0_16] : memref<256x512xbf16, #tpu.memory_space<vmem>>, vector<256x512xbf16>
    %cst_17 = arith.constant dense<0.000000e+00> : vector<8x512xf32>
    %41 = tpu.matmul %39, %40, %cst_17 {dimension_numbers = #tpu.dot_dimension_numbers<[1], [0], [0], [1], [0, 0, 1, 1], [], []>} : vector<8x256xbf16>, vector<256x512xbf16>, vector<8x512xf32> -> vector<8x512xf32>
    %42 = vector.extract_strided_slice %0 {offsets = [3, 0], sizes = [1, 512], strides = [1, 1]} : vector<8x1024xf32> to vector<1x512xf32>
    %43 = vector.extract_strided_slice %0 {offsets = [4, 0], sizes = [1, 512], strides = [1, 1]} : vector<8x1024xf32> to vector<1x512xf32>
    %cst_18 = arith.constant dense<0.000000e+00> : vector<512xf32>
    %44 = vector.multi_reduction <add>, %41, %cst_18 [0] : vector<8x512xf32> to vector<512xf32>
    %45 = vector.shape_cast %44 : vector<512xf32> to vector<1x512xf32>
    %cst_19 = arith.constant 8.000000e+00 : f32
    %46 = vector.broadcast %cst_19 : f32 to vector<1x512xf32>
    %47 = arith.divf %45, %46 : vector<1x512xf32>
    %48 = vector.broadcast %47 : vector<1x512xf32> to vector<8x512xf32>
    %49 = arith.subf %41, %48 : vector<8x512xf32>
    %50 = arith.mulf %49, %49 : vector<8x512xf32>
    %cst_20 = arith.constant dense<0.000000e+00> : vector<512xf32>
    %51 = vector.multi_reduction <add>, %50, %cst_20 [0] : vector<8x512xf32> to vector<512xf32>
    %52 = vector.shape_cast %51 : vector<512xf32> to vector<1x512xf32>
    %cst_21 = arith.constant 8.000000e+00 : f32
    %53 = vector.broadcast %cst_21 : f32 to vector<1x512xf32>
    %54 = arith.divf %52, %53 : vector<1x512xf32>
    %cst_22 = arith.constant 8.000000e-01 : f32
    %55 = vector.broadcast %cst_22 : f32 to vector<1x512xf32>
    %56 = arith.addf %54, %55 : vector<1x512xf32>
    %57 = math.rsqrt %56 : vector<1x512xf32>
    %58 = vector.broadcast %57 : vector<1x512xf32> to vector<8x512xf32>
    %59 = arith.mulf %49, %58 : vector<8x512xf32>
    %60 = vector.broadcast %42 : vector<1x512xf32> to vector<8x512xf32>
    %61 = arith.mulf %59, %60 : vector<8x512xf32>
    %62 = vector.broadcast %43 : vector<1x512xf32> to vector<8x512xf32>
    %63 = arith.addf %61, %62 : vector<8x512xf32>
    %cst_23 = arith.constant 2.000000e-01 : f32
    %64 = vector.broadcast %cst_23 : f32 to vector<8x512xf32>
    %65 = arith.mulf %64, %63 : vector<8x512xf32>
    %66 = arith.maximumf %63, %65 : vector<8x512xf32>
    %67 = arith.truncf %66 : vector<8x512xf32> to vector<8x512xbf16>
    %c0_24 = arith.constant 0 : index
    %c0_25 = arith.constant 0 : index
    %68 = vector.load %arg4[%c0_24, %c0_25] : memref<512x1024xbf16, #tpu.memory_space<vmem>>, vector<512x1024xbf16>
    %cst_26 = arith.constant dense<0.000000e+00> : vector<8x1024xf32>
    %69 = tpu.matmul %67, %68, %cst_26 {dimension_numbers = #tpu.dot_dimension_numbers<[1], [0], [0], [1], [0, 0, 1, 1], [], []>} : vector<8x512xbf16>, vector<512x1024xbf16>, vector<8x1024xf32> -> vector<8x1024xf32>
    %70 = vector.extract_strided_slice %0 {offsets = [5, 0], sizes = [1, 1024], strides = [1, 1]} : vector<8x1024xf32> to vector<1x1024xf32>
    %71 = vector.extract_strided_slice %0 {offsets = [6, 0], sizes = [1, 1024], strides = [1, 1]} : vector<8x1024xf32> to vector<1x1024xf32>
    %cst_27 = arith.constant dense<0.000000e+00> : vector<1024xf32>
    %72 = vector.multi_reduction <add>, %69, %cst_27 [0] : vector<8x1024xf32> to vector<1024xf32>
    %73 = vector.shape_cast %72 : vector<1024xf32> to vector<1x1024xf32>
    %cst_28 = arith.constant 8.000000e+00 : f32
    %74 = vector.broadcast %cst_28 : f32 to vector<1x1024xf32>
    %75 = arith.divf %73, %74 : vector<1x1024xf32>
    %76 = vector.broadcast %75 : vector<1x1024xf32> to vector<8x1024xf32>
    %77 = arith.subf %69, %76 : vector<8x1024xf32>
    %78 = arith.mulf %77, %77 : vector<8x1024xf32>
    %cst_29 = arith.constant dense<0.000000e+00> : vector<1024xf32>
    %79 = vector.multi_reduction <add>, %78, %cst_29 [0] : vector<8x1024xf32> to vector<1024xf32>
    %80 = vector.shape_cast %79 : vector<1024xf32> to vector<1x1024xf32>
    %cst_30 = arith.constant 8.000000e+00 : f32
    %81 = vector.broadcast %cst_30 : f32 to vector<1x1024xf32>
    %82 = arith.divf %80, %81 : vector<1x1024xf32>
    %cst_31 = arith.constant 8.000000e-01 : f32
    %83 = vector.broadcast %cst_31 : f32 to vector<1x1024xf32>
    %84 = arith.addf %82, %83 : vector<1x1024xf32>
    %85 = math.rsqrt %84 : vector<1x1024xf32>
    %86 = vector.broadcast %85 : vector<1x1024xf32> to vector<8x1024xf32>
    %87 = arith.mulf %77, %86 : vector<8x1024xf32>
    %88 = vector.broadcast %70 : vector<1x1024xf32> to vector<8x1024xf32>
    %89 = arith.mulf %87, %88 : vector<8x1024xf32>
    %90 = vector.broadcast %71 : vector<1x1024xf32> to vector<8x1024xf32>
    %91 = arith.addf %89, %90 : vector<8x1024xf32>
    %cst_32 = arith.constant 2.000000e-01 : f32
    %92 = vector.broadcast %cst_32 : f32 to vector<8x1024xf32>
    %93 = arith.mulf %92, %91 : vector<8x1024xf32>
    %94 = arith.maximumf %91, %93 : vector<8x1024xf32>
    %95 = arith.truncf %94 : vector<8x1024xf32> to vector<8x1024xbf16>
    %c0_33 = arith.constant 0 : index
    %c0_34 = arith.constant 0 : index
    %96 = vector.load %arg5[%c0_33, %c0_34] : memref<1024x128xbf16, #tpu.memory_space<vmem>>, vector<1024x128xbf16>
    %cst_35 = arith.constant dense<0.000000e+00> : vector<8x128xf32>
    %97 = tpu.matmul %95, %96, %cst_35 {dimension_numbers = #tpu.dot_dimension_numbers<[1], [0], [0], [1], [0, 0, 1, 1], [], []>} : vector<8x1024xbf16>, vector<1024x128xbf16>, vector<8x128xf32> -> vector<8x128xf32>
    %98 = vector.extract_strided_slice %0 {offsets = [7, 0], sizes = [1, 128], strides = [1, 1]} : vector<8x1024xf32> to vector<1x128xf32>
    %99 = vector.broadcast %98 : vector<1x128xf32> to vector<8x128xf32>
    %100 = arith.addf %97, %99 : vector<8x128xf32>
    %101 = math.tanh %100 : vector<8x128xf32>
    %c0_36 = arith.constant 0 : index
    %c0_37 = arith.constant 0 : index
    %102 = vector.load %arg7[%c0_36, %c0_37] : memref<8x128xf32, #tpu.memory_space<vmem>>, vector<8x128xf32>
    tpu.vector_store %arg7[%c0_36, %c0_37], %101 {strides = array<i32>} : memref<8x128xf32, #tpu.memory_space<vmem>>, vector<8x128xf32>,
    return
  }
}

</mosaic_0001>

<bundles_post_ra>
// kernel: tpu_custom_call.1
= control target key start
LH: loop header
LB: loop body
LE: loop exit
PB: predicated region body
PF: predicated region fallthrough
CT: control target
= control target key end

     0   :  { %12 = vsyncpa [#allocation3], 0  ;;  %s5042_s0 = inlined_call_operand.hbm [shape: f32[8,32], index: 0, kind: input, shape index: {}]   ;;  %s5043_s1 = inlined_call_operand.hbm [shape: bf16[32,128], index: 1, kind: input, shape index: {}]   ;;  %s5044_s2 = inlined_call_operand.hbm [shape: bf16[128,256], index: 2, kind: input, shape index: {}]   ;;  %s5045_s3 = inlined_call_operand.hbm [shape: bf16[256,512], index: 3, kind: input, shape index: {}]   ;;  %s5046_s4 = inlined_call_operand.hbm [shape: bf16[512,1024], index: 4, kind: input, shape index: {}]   ;;  %s5047_s5 = inlined_call_operand.hbm [shape: bf16[1024,128], index: 5, kind: input, shape index: {}]   ;;  %s5048_s6 = inlined_call_operand.hbm [shape: f32[8,1024], index: 6, kind: input, shape index: {}]   ;;  %s5049_s7 = inlined_call_operand.hbm [shape: f32[8,128], index: 7, kind: output, shape index: {}]  }
   0x1   :  { %13 = vsyncpa [#allocation6], 0 }
   0x2   :  { %14 = vsyncpa [#allocation9], 0 }
   0x3   :  { %15 = vsyncpa [#allocation12], 0 }
   0x4   :  { %16 = vsyncpa [#allocation4], 0  ;;  %s4751_s24 = smov [#allocation5]   ;;  %s4565_s28 = scalar_lea.hbm %s5043_s1, 256 }
   0x5   :  { %s32_s25 = sshll.u32 %s4751_s24, 4  ;;  %p4566_p0 = scmp.ne.s32.totalorder %s5043_s1, %s4565_s28  ;;  %s33_s25 = int_to_ptr.vmem [resolvable:$true] %s32_s25 }
   0x6   :  { %p4569_p1 = scmp.lt.u32.totalorder %s4565_s28, %s5043_s1 }
   0x8   :  { %p4571_p2 = pnand %p4569_p1, %p4566_p0 }
   0xa   :  { %4574 = shalt.err (!%p4571_p2)
}
   0xb   :  { %s4575_s10 = scalar_lea.vmem %s33_s25, 256  ;;  %p4580_p4 = scmp.lt.s32.totalorder %s33_s25, %s33_s25 }
   0xc   :  { %p4576_p3 = scmp.ne.s32.totalorder %s33_s25, %s4575_s10  ;;  %p4581_p5 = scmp.lt.s32.totalorder %s4575_s10, %s4575_s10 }
   0xe   :  { %p4582_p6 = por %p4581_p5, %p4580_p4 }
  0x10   :  { %p4583_p7 = pnand %p4582_p6, %p4576_p3 }
  0x12   :  { %4586 = shalt.err (!%p4583_p7)
}
  0x13   :  { %s4752_s11 = smov 64   ;;  %s4753_s12 = smov 4  }
  0x14   :  { %38 = dma.hbm_to_vmem [thread:$0]  %s5043_s1, 256, %s33_s25, [#allocation6], %s4752_s11, %s4752_s11, %s4753_s12  }
  0x15   :  { %s4754_s15 = smov [#allocation8]   ;;  %s4587_s19 = scalar_lea.hbm %s5045_s3, 8192 }
  0x16   :  { %s56_s16 = sshll.u32 %s4754_s15, 4  ;;  %p4588_p8 = scmp.ne.s32.totalorder %s5045_s3, %s4587_s19  ;;  %s57_s16 = int_to_ptr.vmem [resolvable:$true] %s56_s16 }
  0x17   :  { %p4591_p9 = scmp.lt.u32.totalorder %s4587_s19, %s5045_s3 }
  0x19   :  { %p4593_p10 = pnand %p4591_p9, %p4588_p8 }
  0x1b   :  { %4596 = shalt.err (!%p4593_p10)
}
  0x1c   :  { %s4597_s24 = scalar_lea.vmem %s57_s16, 8192  ;;  %p4602_p12 = scmp.lt.s32.totalorder %s57_s16, %s57_s16 }
  0x1d   :  { %p4598_p11 = scmp.ne.s32.totalorder %s57_s16, %s4597_s24  ;;  %p4603_p13 = scmp.lt.s32.totalorder %s4597_s24, %s4597_s24 }
  0x1f   :  { %p4604_p0 = por %p4603_p13, %p4602_p12 }
  0x21   :  { %p4605_p1 = pnand %p4604_p0, %p4598_p11 }
  0x23   :  { %4608 = shalt.err (!%p4605_p1)
}
  0x24   :  { %s4755_s1 = smov 256   ;;  %s4756_s25 = smov 16  }
  0x25   :  { %62 = dma.hbm_to_vmem [thread:$0]  %s5045_s3, 8192, %s57_s16, [#allocation9], %s4755_s1, %s4755_s1, %s4756_s25  }
  0x26   :  { %s4757_s28 = smov [#allocation11]   ;;  %s4758_s30 = smov [#allocation2]  }
  0x27   :  { %s80_s29 = sshll.u32 %s4757_s28, 4  ;;  %s23_s8 = sshll.u32 %s4758_s30, 4  ;;  %s81_s29 = int_to_ptr.vmem [resolvable:$true] %s80_s29  ;;  %s24_s8 = int_to_ptr.vmem [resolvable:$true] %s23_s8 }
  0x28   :  { %s4609_s13 = scalar_lea.hbm %s5047_s5, 8192 }
  0x29   :  { %p4610_p2 = scmp.ne.s32.totalorder %s5047_s5, %s4609_s13  ;;  %p4613_p3 = scmp.lt.u32.totalorder %s4609_s13, %s5047_s5 }
  0x2b   :  { %p4615_p4 = pnand %p4613_p3, %p4610_p2 }
  0x2d   :  { %4618 = shalt.err (!%p4615_p4)
}
  0x2e   :  { %s4619_s3 = scalar_lea.vmem %s81_s29, 8192  ;;  %p4624_p6 = scmp.lt.s32.totalorder %s81_s29, %s81_s29 }
  0x2f   :  { %p4620_p5 = scmp.ne.s32.totalorder %s81_s29, %s4619_s3  ;;  %p4625_p7 = scmp.lt.s32.totalorder %s4619_s3, %s4619_s3 }
  0x31   :  { %p4626_p8 = por %p4625_p7, %p4624_p6 }
  0x33   :  { %p4627_p9 = pnand %p4626_p8, %p4620_p5 }
  0x35   :  { %4630 = shalt.err (!%p4627_p9)
}
  0x36   :  { %86 = dma.hbm_to_vmem [thread:$0]  %s5047_s5, 8192, %s81_s29, [#allocation12], %s4752_s11, %s4752_s11, %s4753_s12  }
  0x37   :  { %s4631_s22 = scalar_lea.hbm %s5042_s0, 128 }
  0x38   :  { %p4632_p10 = scmp.ne.s32.totalorder %s5042_s0, %s4631_s22  ;;  %p4635_p11 = scmp.lt.u32.totalorder %s4631_s22, %s5042_s0 }
  0x3a   :  { %p4637_p12 = pnand %p4635_p11, %p4632_p10 }
  0x3c   :  { %4640 = shalt.err (!%p4637_p12)
}
  0x3d   :  { %s4641_s26 = scalar_lea.vmem %s24_s8, 128  ;;  %p4646_p0 = scmp.lt.s32.totalorder %s24_s8, %s24_s8 }
  0x3e   :  { %p4642_p13 = scmp.ne.s32.totalorder %s24_s8, %s4641_s26  ;;  %p4647_p1 = scmp.lt.s32.totalorder %s4641_s26, %s4641_s26 }
  0x40   :  { %p4648_p2 = por %p4647_p1, %p4646_p0 }
  0x42   :  { %p4649_p3 = pnand %p4648_p2, %p4642_p13 }
  0x44   :  { %4652 = shalt.err (!%p4649_p3)
}
  0x45   :  { %26 = dma.hbm_to_vmem [thread:$0]  %s5042_s0, 128, %s24_s8, [#allocation3]  }
  0x46   :  { %s4759_s12 = smov [#allocation7]   ;;  %s4653_s30 = scalar_lea.hbm %s5044_s2, 2048 }
  0x47   :  { %s44_s27 = sshll.u32 %s4759_s12, 4  ;;  %p4654_p4 = scmp.ne.s32.totalorder %s5044_s2, %s4653_s30  ;;  %s45_s27 = int_to_ptr.vmem [resolvable:$true] %s44_s27 }
  0x48   :  { %p4657_p5 = scmp.lt.u32.totalorder %s4653_s30, %s5044_s2 }
  0x4a   :  { %p4659_p6 = pnand %p4657_p5, %p4654_p4 }
  0x4c   :  { %4662 = shalt.err (!%p4659_p6)
}
  0x4d   :  { %s4663_s15 = scalar_lea.vmem %s45_s27, 2048  ;;  %p4668_p8 = scmp.lt.s32.totalorder %s45_s27, %s45_s27 }
  0x4e   :  { %p4664_p7 = scmp.ne.s32.totalorder %s45_s27, %s4663_s15  ;;  %p4669_p9 = scmp.lt.s32.totalorder %s4663_s15, %s4663_s15 }
  0x50   :  { %p4670_p10 = por %p4669_p9, %p4668_p8 }
  0x52   :  { %p4671_p11 = pnand %p4670_p10, %p4664_p7 }
  0x54   :  { %4674 = shalt.err (!%p4671_p11)
}
  0x55   :  { %s4760_s0 = smov 128   ;;  %s4761_s8 = smov 8  }
  0x56   :  { %50 = dma.hbm_to_vmem [thread:$0]  %s5044_s2, 2048, %s45_s27, [#allocation6], %s4760_s0, %s4760_s0, %s4761_s8  }
  0x57   :  { %s4762_s3 = smov [#allocation10]   ;;  %s4675_s21 = scalar_lea.hbm %s5046_s4, 32768 }
  0x58   :  { %s68_s16 = sshll.u32 %s4762_s3, 4  ;;  %p4676_p12 = scmp.ne.s32.totalorder %s5046_s4, %s4675_s21  ;;  %s69_s16 = int_to_ptr.vmem [resolvable:$true] %s68_s16 }
  0x59   :  { %p4679_p13 = scmp.lt.u32.totalorder %s4675_s21, %s5046_s4 }
  0x5b   :  { %p4681_p0 = pnand %p4679_p13, %p4676_p12 }
  0x5d   :  { %4684 = shalt.err (!%p4681_p0)
}
  0x5e   :  { %s4685_s25 = scalar_lea.vmem %s69_s16, 32768  ;;  %p4690_p2 = scmp.lt.s32.totalorder %s69_s16, %s69_s16 }
  0x5f   :  { %p4686_p1 = scmp.ne.s32.totalorder %s69_s16, %s4685_s25  ;;  %p4691_p3 = scmp.lt.s32.totalorder %s4685_s25, %s4685_s25 }
  0x61   :  { %p4692_p4 = por %p4691_p3, %p4690_p2 }
  0x63   :  { %p4693_p5 = pnand %p4692_p4, %p4686_p1 }
  0x65   :  { %4696 = shalt.err (!%p4693_p5)
}
  0x66   :  { %s4763_s2 = smov 512   ;;  %s4764_s26 = smov 32  }
  0x67   :  { %74 = dma.hbm_to_vmem [thread:$0]  %s5046_s4, 32768, %s69_s16, [#allocation9], %s4763_s2, %s4763_s2, %s4764_s26  }
  0x68   :  { %s4765_s12 = smov [#allocation13]   ;;  %s4697_s30 = scalar_lea.hbm %s5048_s6, 1024 }
  0x69   :  { %s93_s27 = sshll.u32 %s4765_s12, 4  ;;  %p4698_p6 = scmp.ne.s32.totalorder %s5048_s6, %s4697_s30  ;;  %s94_s27 = int_to_ptr.vmem [resolvable:$true] %s93_s27 }
  0x6a   :  { %p4701_p7 = scmp.lt.u32.totalorder %s4697_s30, %s5048_s6 }
  0x6c   :  { %p4703_p8 = pnand %p4701_p7, %p4698_p6 }
  0x6e   :  { %4706 = shalt.err (!%p4703_p8)
}
  0x6f   :  { %s4707_s15 = scalar_lea.vmem %s94_s27, 1024  ;;  %p4712_p10 = scmp.lt.s32.totalorder %s94_s27, %s94_s27 }
  0x70   :  { %p4708_p9 = scmp.ne.s32.totalorder %s94_s27, %s4707_s15  ;;  %p4713_p11 = scmp.lt.s32.totalorder %s4707_s15, %s4707_s15 }
  0x72   :  { %p4714_p12 = por %p4713_p11, %p4712_p10 }
  0x74   :  { %p4715_p13 = pnand %p4714_p12, %p4708_p9 }
  0x76   :  { %4718 = shalt.err (!%p4715_p13)
}
  0x77   :  { %96 = dma.hbm_to_vmem [thread:$0]  %s5048_s6, 1024, %s94_s27, [#allocation12]  }
  0x78   :  { %4741 = dma.done.wait [#allocation3], 128  }
  0x79   :  { %4742 = vsyncadd [#allocation3], 4294967168 }
  0x7a   :  { %4743 = dma.done.wait [#allocation6], 2304  }
  0x7b   :  { %4744 = vsyncadd [#allocation6], 4294964992 }
  0x7c   :  { %4745 = dma.done.wait [#allocation9], 40960  }
  0x7d   :  { %4746 = vsyncadd [#allocation9], 4294926336 }
  0x7e   :  { %4747 = dma.done.wait [#allocation12], 9216  }
  0x7f   :  { %4748 = vsyncadd [#allocation12], 4294958080  ;;  %v4766_v0 = vmov 0.0   ;;  %vm4767_vm0 = vmmov 0   ;;  %v4345_v1 = vld [vmem:[#allocation5] sm:$0xff]   ;;  %v4346_v2 = vld [vmem:[#allocation5 + $0x8] sm:$0xff]   ;;  %v133_v25 = vlaneseq }
  0x80   :  { %4302 = vmatprep.subr.bf16.mxu0 %v4766_v0  ;;  %4306 = vmatprep.mubr.msk.bf16.mxu0 %vm4767_vm0, %v4766_v0  ;;  %v127_v3 = vld [vmem:[#allocation2] sm:$0xff]  ;;  %v4350_v6 = vld [vmem:[#allocation7 + $0x14] ss:$8 sps:$4 sm:$0xff]   ;;  %vm149_vm1 = vcmask 261120   ;;  %v4352_v8 = vld [vmem:[#allocation7 + $0x10] ss:$8 sps:$4 sm:$0xff]  }
  0x81   :  { %4303 = vmatpush3.bf16.msra.mxu0 %v4345_v1  ;;  %v4347_v4 = vld [vmem:[#allocation7 + $0x4] ss:$8 sps:$4 sm:$0xff]   ;;  %v4349_v5 = vld [vmem:[#allocation7] ss:$8 sps:$4 sm:$0xff]   ;;  %v128_v7 = vpack.c.bf16 %v127_v3, %v127_v3  ;;  %v4356_v11 = vld [vmem:[#allocation7 + $0x34] ss:$8 sps:$4 sm:$0xff]  }
  0x82   :  { %4304 = vmatprep.subr.bf16.mxu0 %v4766_v0  ;;  %292 = vmatprep.subr.bf16.mxu1 %v4347_v4  ;;  %v4353_v9 = vld [vmem:[#allocation7 + $0x24] ss:$8 sps:$4 sm:$0xff]   ;;  %v4355_v10 = vld [vmem:[#allocation7 + $0x20] ss:$8 sps:$4 sm:$0xff]   ;;  %v4358_v12 = vld [vmem:[#allocation7 + $0x30] ss:$8 sps:$4 sm:$0xff]  }
  0x83   :  { %293 = vmatpush1.bf16.msra.mxu1 %v4349_v5  ;;  %v4359_v13 = vld [vmem:[#allocation7 + $0x44] ss:$8 sps:$4 sm:$0xff]   ;;  %v4361_v14 = vld [vmem:[#allocation7 + $0x40] ss:$8 sps:$4 sm:$0xff]   ;;  %v4362_v15 = vld [vmem:[#allocation7 + $0x54] ss:$8 sps:$4 sm:$0xff]  }
  0x84   :  { %294 = vmatprep.subr.bf16.mxu1 %v4350_v6  ;;  %v4364_v16 = vld [vmem:[#allocation7 + $0x50] ss:$8 sps:$4 sm:$0xff]   ;;  %v4365_v17 = vld [vmem:[#allocation7 + $0x64] ss:$8 sps:$4 sm:$0xff]   ;;  %v4367_v18 = vld [vmem:[#allocation7 + $0x60] ss:$8 sps:$4 sm:$0xff]  }
  0x85   :  { %4305 = vmatpush3.bf16.msra.mxu0 %v4346_v2  ;;  %v4368_v19 = vld [vmem:[#allocation7 + $0x74] ss:$8 sps:$4 sm:$0xff]   ;;  %v4370_v20 = vld [vmem:[#allocation7 + $0x70] ss:$8 sps:$4 sm:$0xff]   ;;  %v4768_v21 = vmov 0   ;;  %v4900_v26 = vshrl.u32 %v133_v25, 7 }
  0x86   :  { %324 = vmatprep.mubr.bf16.mxu1 %v4768_v21  ;;  %v4371_v22 = vld [vmem:[#allocation8] ss:$16 sps:$4 sm:$0xff]   ;;  %v4373_v23 = vld [vmem:[#allocation8 + $0x4] ss:$16 sps:$4 sm:$0xff]   ;;  %v4376_v24 = vld [vmem:[#allocation8 + $0xc] ss:$16 sps:$4 sm:$0xff]  }
  0x87   :  { %295 = vmatpush1.bf16.msra.mxu1 %v4352_v8  ;;  %782 = vmatprep.subr.bf16.mxu0 %v4373_v23  ;;  %v135_v27 = vsub.s32 0, %v4900_v26  ;;  %v4903_v28 = vld [vmem:[#allocation13] sm:$0xff]  ;;  %v4374_v37 = vld [vmem:[#allocation8 + $0x8] ss:$16 sps:$4 sm:$0xff]   ;;  %v4382_v40 = vld [vmem:[#allocation8 + $0x2c] ss:$16 sps:$4 sm:$0xff]  }
  0x88   :  { %4307 = vmatmul.mubr.msk.bf16.vlgmr.msra.gmra.mrb[0].mxu0 %vm149_vm1, %v128_v7  ;;  %296 = vmatprep.subr.bf16.mxu1 %v4353_v9  ;;  %v4379_v39 = vld [vmem:[#allocation8 + $0x24] ss:$16 sps:$4 sm:$0xff]   ;;  %v4377_v41 = vld [vmem:[#allocation8 + $0x20] ss:$16 sps:$4 sm:$0xff]   ;;  %v4380_v42 = vld [vmem:[#allocation8 + $0x28] ss:$16 sps:$4 sm:$0xff]  }
  0x89   :  { %783 = vmatpush1.bf16.msra.mxu0 %v4371_v22  ;;  %v136_v29 = vrot.slane %v4903_v28, %v135_v27  ;;  %v4385_v43 = vld [vmem:[#allocation8 + $0x44] ss:$16 sps:$4 sm:$0xff]   ;;  %v4388_v44 = vld [vmem:[#allocation8 + $0x4c] ss:$16 sps:$4 sm:$0xff]   ;;  %v4383_v45 = vld [vmem:[#allocation8 + $0x40] ss:$16 sps:$4 sm:$0xff]  }
  0x8a   :  { %784 = vmatprep.subr.bf16.mxu0 %v4379_v39  ;;  %v4386_v46 = vld [vmem:[#allocation8 + $0x48] ss:$16 sps:$4 sm:$0xff]   ;;  %v4391_v47 = vld [vmem:[#allocation8 + $0x64] ss:$16 sps:$4 sm:$0xff]   ;;  %v4394_v48 = vld [vmem:[#allocation8 + $0x6c] ss:$16 sps:$4 sm:$0xff]  }
  0x8b   :  { %297 = vmatpush1.bf16.msra.mxu1 %v4355_v10  ;;  %v4389_v49 = vld [vmem:[#allocation8 + $0x60] ss:$16 sps:$4 sm:$0xff]   ;;  %v4392_v50 = vld [vmem:[#allocation8 + $0x68] ss:$16 sps:$4 sm:$0xff]   ;;  %v4397_v51 = vld [vmem:[#allocation8 + $0x84] ss:$16 sps:$4 sm:$0xff]  }
  0x8c   :  { %298 = vmatprep.subr.bf16.mxu1 %v4356_v11  ;;  %v4400_v52 = vld [vmem:[#allocation8 + $0x8c] ss:$16 sps:$4 sm:$0xff]   ;;  %v4395_v53 = vld [vmem:[#allocation8 + $0x80] ss:$16 sps:$4 sm:$0xff]   ;;  %v4398_v54 = vld [vmem:[#allocation8 + $0x88] ss:$16 sps:$4 sm:$0xff]  }
  0x8d   :  { %785 = vmatpush1.bf16.msra.mxu0 %v4377_v41  ;;  %v4403_v55 = vld [vmem:[#allocation8 + $0xa4] ss:$16 sps:$4 sm:$0xff]   ;;  %v4406_v56 = vld [vmem:[#allocation8 + $0xac] ss:$16 sps:$4 sm:$0xff]   ;;  %v4401_v57 = vld [vmem:[#allocation8 + $0xa0] ss:$16 sps:$4 sm:$0xff]  }
  0x8e   :  { %786 = vmatprep.subr.bf16.mxu0 %v4385_v43  ;;  %v4404_v58 = vld [vmem:[#allocation8 + $0xa8] ss:$16 sps:$4 sm:$0xff]   ;;  %v4409_v59 = vld [vmem:[#allocation8 + $0xc4] ss:$16 sps:$4 sm:$0xff]   ;;  %v4412_v60 = vld [vmem:[#allocation8 + $0xcc] ss:$16 sps:$4 sm:$0xff]  }
  0x8f   :  { %299 = vmatpush1.bf16.msra.mxu1 %v4358_v12  ;;  %v4407_v61 = vld [vmem:[#allocation8 + $0xc0] ss:$16 sps:$4 sm:$0xff]   ;;  %v4410_v62 = vld [vmem:[#allocation8 + $0xc8] ss:$16 sps:$4 sm:$0xff]   ;;  %v4415_v63 = vld [vmem:[#allocation8 + $0xe4] ss:$16 sps:$4 sm:$0xff]  }
  0x90   :  { %300 = vmatprep.subr.bf16.mxu1 %v4359_v13  ;;  %v4418_v0 = vld [vmem:[#allocation8 + $0xec] ss:$16 sps:$4 sm:$0xff]   ;;  %v4413_v1 = vld [vmem:[#allocation8 + $0xe0] ss:$16 sps:$4 sm:$0xff]   ;;  %v4416_v2 = vld [vmem:[#allocation8 + $0xe8] ss:$16 sps:$4 sm:$0xff]  }
  0x91   :  { %787 = vmatpush1.bf16.msra.mxu0 %v4383_v45  ;;  %v4421_v3 = vld [vmem:[#allocation8 + $0x104] ss:$16 sps:$4 sm:$0xff]   ;;  %v4424_v4 = vld [vmem:[#allocation8 + $0x10c] ss:$16 sps:$4 sm:$0xff]   ;;  %v4419_v5 = vld [vmem:[#allocation8 + $0x100] ss:$16 sps:$4 sm:$0xff]  }
  0x92   :  { %788 = vmatprep.subr.bf16.mxu0 %v4391_v47  ;;  %v4422_v6 = vld [vmem:[#allocation8 + $0x108] ss:$16 sps:$4 sm:$0xff]   ;;  %v4427_v7 = vld [vmem:[#allocation8 + $0x124] ss:$16 sps:$4 sm:$0xff]   ;;  %v4430_v8 = vld [vmem:[#allocation8 + $0x12c] ss:$16 sps:$4 sm:$0xff]  }
  0x93   :  { %301 = vmatpush1.bf16.msra.mxu1 %v4361_v14  ;;  %v4425_v9 = vld [vmem:[#allocation8 + $0x120] ss:$16 sps:$4 sm:$0xff]   ;;  %v4428_v10 = vld [vmem:[#allocation8 + $0x128] ss:$16 sps:$4 sm:$0xff]   ;;  %v4433_v11 = vld [vmem:[#allocation8 + $0x144] ss:$16 sps:$4 sm:$0xff]  }
  0x94   :  { %302 = vmatprep.subr.bf16.mxu1 %v4362_v15  ;;  %v4436_v12 = vld [vmem:[#allocation8 + $0x14c] ss:$16 sps:$4 sm:$0xff]   ;;  %v4431_v13 = vld [vmem:[#allocation8 + $0x140] ss:$16 sps:$4 sm:$0xff]   ;;  %v4434_v14 = vld [vmem:[#allocation8 + $0x148] ss:$16 sps:$4 sm:$0xff]  }
  0x95   :  { %789 = vmatpush1.bf16.msra.mxu0 %v4389_v49  ;;  %v4439_v15 = vld [vmem:[#allocation8 + $0x164] ss:$16 sps:$4 sm:$0xff]   ;;  %v4443_v21 = vld [vmem:[#allocation8 + $0x180] ss:$16 sps:$4 sm:$0xff]   ;;  %v4446_v22 = vld [vmem:[#allocation8 + $0x188] ss:$16 sps:$4 sm:$0xff]  }
  0x96   :  { %790 = vmatprep.subr.bf16.mxu0 %v4397_v51  ;;  %v4451_v23 = vld [vmem:[#allocation8 + $0x1a4] ss:$16 sps:$4 sm:$0xff]   ;;  %v4449_v25 = vld [vmem:[#allocation8 + $0x1a0] ss:$16 sps:$4 sm:$0xff]   ;;  %v4452_v27 = vld [vmem:[#allocation8 + $0x1a8] ss:$16 sps:$4 sm:$0xff]  }
  0x97   :  { %303 = vmatpush1.bf16.msra.mxu1 %v4364_v16  ;;  %v4442_v16 = vld [vmem:[#allocation8 + $0x16c] ss:$16 sps:$4 sm:$0xff]   ;;  %s4769_s6 = smov [#allocation14]  }
  0x98   :  { %304 = vmatprep.subr.bf16.mxu1 %v4365_v17  ;;  %v4437_v17 = vld [vmem:[#allocation8 + $0x160] ss:$16 sps:$4 sm:$0xff]   ;;  %v4910_v39 = vld [vmem:[#allocation10 + $0x8] sm:$0xff]  ;;  %s3796_s8 = sshll.u32 %s4769_s6, 4  ;;  %s3797_s8 = int_to_ptr.vmem [resolvable:$true] %s3796_s8 }
  0x99   :  { %791 = vmatpush1.bf16.msra.mxu0 %v4395_v53  ;;  %s4719_s17 = scalar_lea.vmem %s3797_s8, 128  ;;  %p4724_p1 = scmp.lt.s32.totalorder %s3797_s8, %s3797_s8 }
  0x9a   :  { %792 = vmatprep.subr.bf16.mxu0 %v4403_v55  ;;  %p4720_p0 = scmp.ne.s32.totalorder %s3797_s8, %s4719_s17  ;;  %p4725_p2 = scmp.lt.s32.totalorder %s4719_s17, %s4719_s17 }
  0x9b   :  { %305 = vmatpush1.bf16.msra.mxu1 %v4367_v18  ;;  %v4440_v18 = vld [vmem:[#allocation8 + $0x168] ss:$16 sps:$4 sm:$0xff]  }
  0x9c   :  { %306 = vmatprep.subr.bf16.mxu1 %v4368_v19  ;;  %v4445_v19 = vld [vmem:[#allocation8 + $0x184] ss:$16 sps:$4 sm:$0xff]   ;;  %p4726_p3 = por %p4725_p2, %p4724_p1 }
  0x9d   :  { %793 = vmatpush1.bf16.msra.mxu0 %v4401_v57 }
  0x9e   :  { %794 = vmatprep.subr.bf16.mxu0 %v4409_v59  ;;  %p4727_p4 = pnand %p4726_p3, %p4720_p0 }
  0x9f   :  { %307 = vmatpush1.bf16.msra.mxu1 %v4370_v20  ;;  %v4448_v20 = vld [vmem:[#allocation8 + $0x18c] ss:$16 sps:$4 sm:$0xff]  }
  0xa0   :  { %823 = vmatprep.subr.bf16.mxu1 %v4376_v24  ;;  %v4454_v24 = vld [vmem:[#allocation8 + $0x1ac] ss:$16 sps:$4 sm:$0xff]  }
  0xa1   :  { %795 = vmatpush1.bf16.msra.mxu0 %v4407_v61 }
  0xa2   :  { %796 = vmatprep.subr.bf16.mxu0 %v4415_v63 }
  0xa5   :  { %797 = vmatpush1.bf16.msra.mxu0 %v4413_v1 }
  0xa6   :  { %798 = vmatprep.subr.bf16.mxu0 %v4421_v3 }
  0xa9   :  { %799 = vmatpush1.bf16.msra.mxu0 %v4419_v5 }
  0xaa   :  { %800 = vmatprep.subr.bf16.mxu0 %v4427_v7 }
  0xad   :  { %801 = vmatpush1.bf16.msra.mxu0 %v4425_v9 }
  0xae   :  { %802 = vmatprep.subr.bf16.mxu0 %v4433_v11 }
  0xb1   :  { %803 = vmatpush1.bf16.msra.mxu0 %v4431_v13 }
  0xb2   :  { %804 = vmatprep.subr.bf16.mxu0 %v4439_v15 }
  0xb5   :  { %805 = vmatpush1.bf16.msra.mxu0 %v4437_v17 }
  0xb6   :  { %806 = vmatprep.subr.bf16.mxu0 %v4445_v19  ;;  %v374_v19 = vsub.s32 1, %v4900_v26 }
  0xb9   :  { %807 = vmatpush1.bf16.msra.mxu0 %v4443_v21  ;;  %v4924_v21 = vld [vmem:[#allocation13 + $0x8] sm:$0xff] }
  0xba   :  { %808 = vmatprep.subr.bf16.mxu0 %v4451_v23 }
  0xbd   :  { %809 = vmatpush1.bf16.msra.mxu0 %v4449_v25 }
 0x15b   :  { %v187_v30 = vpop.f32.mrb[0].mxu0 }
 0x15c   :  { %v188_v31 = vadd.f32 %v187_v30, %v136_v29  ;;  %v4308_v32 = vpop.f32.mrb[1].mxu0  ;;  %v4455_v29 = vld [vmem:[#allocation8 + $0x1c0] ss:$16 sps:$4 sm:$0xff]   ;;  %v4457_v30 = vld [vmem:[#allocation8 + $0x1c4] ss:$16 sps:$4 sm:$0xff]  }
 0x15d   :  { %v190_v33 = vpop.f32.mrb[2].mxu0  ;;  %v4460_v32 = vld [vmem:[#allocation8 + $0x1cc] ss:$16 sps:$4 sm:$0xff]   ;;  %810 = vmatprep.subr.bf16.mxu0 %v4457_v30 }
 0x15e   :  { %v193_v34 = vmul.f32 0.2, %v188_v31  ;;  %v4309_v35 = vpop.f32.mrb[3].mxu0  ;;  %v4463_v33 = vld [vmem:[#allocation8 + $0x1e4] ss:$16 sps:$4 sm:$0xff]   ;;  %811 = vmatpush1.bf16.msra.mxu0 %v4455_v29 }
 0x15f   :  { %v4461_v35 = vld [vmem:[#allocation8 + $0x1e0] ss:$16 sps:$4 sm:$0xff]   ;;  %812 = vmatprep.subr.bf16.mxu0 %v4463_v33 }
 0x160   :  { %v194_v36 = vmax.f32 %v188_v31, %v193_v34  ;;  %v4458_v31 = vld [vmem:[#allocation8 + $0x1c8] ss:$16 sps:$4 sm:$0xff]   ;;  %v4466_v34 = vld [vmem:[#allocation8 + $0x1ec] ss:$16 sps:$4 sm:$0xff]  }
 0x162   :  { %v195_v38 = vpack.c.bf16 %v194_v36, %v194_v36  ;;  %v4464_v36 = vld [vmem:[#allocation8 + $0x1e8] ss:$16 sps:$4 sm:$0xff]   ;;  %813 = vmatpush1.bf16.msra.mxu0 %v4461_v35 }
 0x164   :  { %325 = vmatmul.mubr.bf16.vlgmr.msra.gmra.mrb[0].mxu1 %v195_v38  ;;  %v4908_v38 = vld [vmem:[#allocation10 + $0x20] sm:$0xff] }
 0x165   :  { %824 = vmatpush1.bf16.msra.mxu1 %v4374_v37  ;;  %v4906_v37 = vld [vmem:[#allocation10] sm:$0xff] }
 0x166   :  { %825 = vmatprep.subr.bf16.mxu1 %v4382_v40  ;;  %v3891_v40 = vcombine.low %v4906_v37, %v4908_v38  ;;  %v3892_v41 = vcombine.high %v4906_v37, %v4908_v38  ;;  %v1016_v37 = vld [vmem:[#allocation10 + $0xc0] sm:$0xff] }
 0x167   :  { %v1020_v38 = vld [vmem:[#allocation10 + $0xe0] sm:$0xff] }
 0x168   :  { %2528 = vmatprep.subr.bf16.mxu0 %v3892_v41 }
 0x169   :  { %826 = vmatpush1.bf16.msra.mxu1 %v4380_v42  ;;  %v4916_v42 = vld [vmem:[#allocation10 + $0x28] sm:$0xff] }
 0x16a   :  { %827 = vmatprep.subr.bf16.mxu1 %v4388_v44  ;;  %v3893_v43 = vcombine.low %v4910_v39, %v4916_v42  ;;  %v3894_v44 = vcombine.high %v4910_v39, %v4916_v42  ;;  %v1017_v39 = vld [vmem:[#allocation10 + $0xc8] sm:$0xff] }
 0x16b   :  { %v1021_v42 = vld [vmem:[#allocation10 + $0xe8] sm:$0xff] }
 0x16d   :  { %828 = vmatpush1.bf16.msra.mxu1 %v4386_v46 }
 0x16e   :  { %829 = vmatprep.subr.bf16.mxu1 %v4394_v48 }
 0x171   :  { %830 = vmatpush1.bf16.msra.mxu1 %v4392_v50 }
 0x172   :  { %831 = vmatprep.subr.bf16.mxu1 %v4400_v52 }
 0x175   :  { %832 = vmatpush1.bf16.msra.mxu1 %v4398_v54 }
 0x176   :  { %833 = vmatprep.subr.bf16.mxu1 %v4406_v56 }
 0x179   :  { %834 = vmatpush1.bf16.msra.mxu1 %v4404_v58 }
 0x17a   :  { %835 = vmatprep.subr.bf16.mxu1 %v4412_v60 }
 0x17d   :  { %836 = vmatpush1.bf16.msra.mxu1 %v4410_v62 }
 0x17e   :  { %837 = vmatprep.subr.bf16.mxu1 %v4418_v0 }
 0x181   :  { %838 = vmatpush1.bf16.msra.mxu1 %v4416_v2 }
 0x182   :  { %839 = vmatprep.subr.bf16.mxu1 %v4424_v4 }
 0x185   :  { %840 = vmatpush1.bf16.msra.mxu1 %v4422_v6 }
 0x186   :  { %841 = vmatprep.subr.bf16.mxu1 %v4430_v8 }
 0x189   :  { %842 = vmatpush1.bf16.msra.mxu1 %v4428_v10 }
 0x18a   :  { %843 = vmatprep.subr.bf16.mxu1 %v4436_v12 }
 0x18d   :  { %844 = vmatpush1.bf16.msra.mxu1 %v4434_v14 }
 0x18e   :  { %845 = vmatprep.subr.bf16.mxu1 %v4442_v16 }
 0x191   :  { %846 = vmatpush1.bf16.msra.mxu1 %v4440_v18 }
 0x192   :  { %847 = vmatprep.subr.bf16.mxu1 %v4448_v20  ;;  %v384_v20 = vsub.s32 2, %v4900_v26 }
 0x194   :  { %v385_v29 = vrot.slane %v4903_v28, %v384_v20 }
 0x195   :  { %848 = vmatpush1.bf16.msra.mxu1 %v4446_v22  ;;  %v375_v22 = vrot.slane %v4903_v28, %v374_v19 }
 0x196   :  { %849 = vmatprep.subr.bf16.mxu1 %v4454_v24  ;;  %v379_v24 = vrot.slane %v4924_v21, %v374_v19  ;;  %v1044_v19 = vld [vmem:[#allocation10 + $0x1a0] sm:$0xff] }
 0x199   :  { %850 = vmatpush1.bf16.msra.mxu1 %v4452_v27 }
 0x19a   :  { %851 = vmatprep.subr.bf16.mxu1 %v4460_v32 }
 0x19d   :  { %852 = vmatpush1.bf16.msra.mxu1 %v4458_v31  ;;  %v389_v31 = vrot.slane %v4924_v21, %v384_v20  ;;  %v1041_v20 = vld [vmem:[#allocation10 + $0x188] sm:$0xff] }
 0x19e   :  { %853 = vmatprep.subr.bf16.mxu1 %v4466_v34 }
 0x1a1   :  { %854 = vmatpush1.bf16.msra.mxu1 %v4464_v36 }
 0x1a2   :  { %2610 = vmatprep.subr.bf16.mxu1 %v3894_v44 }
 0x237   :  { %v326_v45 = vpop.f32.mrb[0].mxu1 }
 0x238   :  { %v333_v46 = vrot.slane %v326_v45, 4  ;;  %v328_v47 = vpop.f32.mrb[1].mxu1 }
 0x239   :  { %v339_v48 = vrot.slane %v328_v47, 4  ;;  %v330_v49 = vpop.f32.mrb[2].mxu1 }
 0x23a   :  { %v334_v50 = vadd.f32 %v333_v46, %v326_v45  ;;  %v331_v51 = vpop.f32.mrb[3].mxu1  ;;  %v1005_v49 = vld [vmem:[#allocation10 + $0x68] sm:$0xff] }
 0x23b   :  { %v340_v52 = vadd.f32 %v339_v48, %v328_v47  ;;  %v1001_v48 = vld [vmem:[#allocation10 + $0x48] sm:$0xff] }
 0x23c   :  { %v335_v53 = vrot.slane %v334_v50, 2 }
 0x23d   :  { %v341_v54 = vrot.slane %v340_v52, 2 }
 0x23e   :  { %v336_v55 = vadd.f32 %v335_v53, %v334_v50  ;;  %v3902_v53 = vcombine.high %v1001_v48, %v1005_v49 }
 0x23f   :  { %v342_v56 = vadd.f32 %v341_v54, %v340_v52 }
 0x240   :  { %v337_v57 = vrot.slane %v336_v55, 1 }
 0x241   :  { %v343_v58 = vrot.slane %v342_v56, 1 }
 0x242   :  { %v338_v59 = vadd.f32 %v337_v57, %v336_v55  ;;  %v3901_v55 = vcombine.low %v1001_v48, %v1005_v49  ;;  %v1012_v57 = vld [vmem:[#allocation10 + $0xa0] sm:$0xff] }
 0x243   :  { %v344_v60 = vadd.f32 %v343_v58, %v342_v56  ;;  %v1008_v56 = vld [vmem:[#allocation10 + $0x80] sm:$0xff]  ;;  %v1009_v58 = vld [vmem:[#allocation10 + $0x88] sm:$0xff] }
 0x244   :  { %v346_v61 = vmul.f32 0.125, %v338_v59  ;;  %v3908_v59 = vcombine.high %v1008_v56, %v1012_v57 }
 0x245   :  { %v347_v62 = vmul.f32 0.125, %v344_v60  ;;  %v1013_v60 = vld [vmem:[#allocation10 + $0xa8] sm:$0xff] }
 0x246   :  { %v348_v63 = vsub.f32 %v326_v45, %v346_v61  ;;  %v1000_v45 = vld [vmem:[#allocation10 + $0x40] sm:$0xff]  ;;  %v3907_v61 = vcombine.low %v1008_v56, %v1012_v57 }
 0x247   :  { %v349_v0 = vsub.f32 %v328_v47, %v347_v62  ;;  %v1004_v47 = vld [vmem:[#allocation10 + $0x60] sm:$0xff]  ;;  %v3909_v62 = vcombine.low %v1009_v58, %v1013_v60 }
 0x248   :  { %v350_v1 = vmul.f32 %v348_v63, %v348_v63  ;;  %v3900_v52 = vcombine.high %v1000_v45, %v1004_v47  ;;  %v3899_v54 = vcombine.low %v1000_v45, %v1004_v47  ;;  %v1057_v45 = vld [vmem:[#allocation10 + $0x208] sm:$0xff] }
 0x249   :  { %v351_v2 = vmul.f32 %v349_v0, %v349_v0  ;;  %v1061_v47 = vld [vmem:[#allocation10 + $0x228] sm:$0xff] }
 0x24a   :  { %v352_v3 = vrot.slane %v350_v1, 4  ;;  %v3957_v49 = vcombine.low %v1057_v45, %v1061_v47 }
 0x24b   :  { %v358_v4 = vrot.slane %v351_v2, 4 }
 0x24c   :  { %v353_v5 = vadd.f32 %v352_v3, %v350_v1  ;;  %v3918_v1 = vcombine.high %v1017_v39, %v1021_v42  ;;  %v1028_v3 = vld [vmem:[#allocation10 + $0x120] sm:$0xff] }
 0x24d   :  { %v359_v6 = vadd.f32 %v358_v4, %v351_v2  ;;  %v1024_v2 = vld [vmem:[#allocation10 + $0x100] sm:$0xff]  ;;  %v1025_v4 = vld [vmem:[#allocation10 + $0x108] sm:$0xff] }
 0x24e   :  { %v354_v7 = vrot.slane %v353_v5, 2 }
 0x24f   :  { %v360_v8 = vrot.slane %v359_v6, 2 }
 0x250   :  { %v355_v9 = vadd.f32 %v354_v7, %v353_v5  ;;  %v3924_v5 = vcombine.high %v1024_v2, %v1028_v3  ;;  %v3923_v7 = vcombine.low %v1024_v2, %v1028_v3 }
 0x251   :  { %v361_v10 = vadd.f32 %v360_v8, %v359_v6  ;;  %v1029_v6 = vld [vmem:[#allocation10 + $0x128] sm:$0xff] }
 0x252   :  { %v356_v11 = vrot.slane %v355_v9, 1  ;;  %v3925_v8 = vcombine.low %v1025_v4, %v1029_v6 }
 0x253   :  { %v362_v12 = vrot.slane %v361_v10, 1 }
 0x254   :  { %v357_v13 = vadd.f32 %v356_v11, %v355_v9  ;;  %v3926_v9 = vcombine.high %v1025_v4, %v1029_v6  ;;  %v1036_v11 = vld [vmem:[#allocation10 + $0x160] sm:$0xff] }
 0x255   :  { %v363_v14 = vadd.f32 %v362_v12, %v361_v10  ;;  %v1032_v10 = vld [vmem:[#allocation10 + $0x140] sm:$0xff]  ;;  %v1033_v12 = vld [vmem:[#allocation10 + $0x148] sm:$0xff] }
 0x256   :  { %v364_v15 = vmul.f32 0.125, %v357_v13  ;;  %v3932_v13 = vcombine.high %v1032_v10, %v1036_v11  ;;  %v1092_v6 = vld [vmem:[#allocation10 + $0x320] sm:$0xff] }
 0x257   :  { %v365_v16 = vmul.f32 0.125, %v363_v14  ;;  %v1037_v14 = vld [vmem:[#allocation10 + $0x168] sm:$0xff] }
 0x258   :  { %v366_v17 = vadd.f32 0.8, %v364_v15  ;;  %v3931_v15 = vcombine.low %v1032_v10, %v1036_v11 }
 0x259   :  { %v367_v18 = vadd.f32 0.8, %v365_v16  ;;  %v3933_v16 = vcombine.low %v1033_v12, %v1037_v14 }
 0x25a   :  { %4531 = vrsqrt.f32 %v366_v17  ;;  %v3934_v17 = vcombine.high %v1033_v12, %v1037_v14  ;;  %v1100_v14 = vld [vmem:[#allocation10 + $0x360] sm:$0xff] }
 0x25b   :  { %4533 = vrsqrt.f32 %v367_v18  ;;  %v1040_v18 = vld [vmem:[#allocation10 + $0x180] sm:$0xff] }
 0x264   :  { %v4532_v23 = vpop.eup %4531 }
 0x265   :  { %v4534_v25 = vpop.eup %4533  ;;  %v370_v27 = vmul.f32 %v4532_v23, %v348_v63  ;;  %v3910_v63 = vcombine.high %v1009_v58, %v1013_v60  ;;  %v1045_v23 = vld [vmem:[#allocation10 + $0x1a8] sm:$0xff]  ;;  %v1076_v60 = vld [vmem:[#allocation10 + $0x2a0] sm:$0xff] }
 0x266   :  { %v371_v30 = vmul.f32 %v4534_v25, %v349_v0  ;;  %v3917_v0 = vcombine.low %v1017_v39, %v1021_v42  ;;  %v3941_v25 = vcombine.low %v1041_v20, %v1045_v23  ;;  %v1084_v42 = vld [vmem:[#allocation10 + $0x2e0] sm:$0xff] }
 0x267   :  { %v380_v32 = vmul.f32 %v375_v22, %v370_v27  ;;  %v3940_v22 = vcombine.high %v1040_v18, %v1044_v19  ;;  %v3942_v27 = vcombine.high %v1041_v20, %v1045_v23  ;;  %v1108_v23 = vld [vmem:[#allocation10 + $0x3a0] sm:$0xff] }
 0x268   :  { %v381_v33 = vmul.f32 %v379_v24, %v371_v30  ;;  %v3939_v24 = vcombine.low %v1040_v18, %v1044_v19  ;;  %v1052_v30 = vld [vmem:[#allocation10 + $0x1e0] sm:$0xff] }
 0x269   :  { %v390_v34 = vadd.f32 %v385_v29, %v380_v32  ;;  %v1048_v29 = vld [vmem:[#allocation10 + $0x1c0] sm:$0xff] }
 0x26a   :  { %v391_v35 = vadd.f32 %v389_v31, %v381_v33  ;;  %v1049_v31 = vld [vmem:[#allocation10 + $0x1c8] sm:$0xff]  ;;  %v3948_v32 = vcombine.high %v1048_v29, %v1052_v30 }
 0x26b   :  { %v392_v36 = vmul.f32 0.2, %v390_v34  ;;  %v1053_v33 = vld [vmem:[#allocation10 + $0x1e8] sm:$0xff] }
 0x26c   :  { %v393_v41 = vmul.f32 0.2, %v391_v35 }
 0x26d   :  { %v394_v44 = vmax.f32 %v390_v34, %v392_v36  ;;  %v3947_v34 = vcombine.low %v1048_v29, %v1052_v30  ;;  %v3950_v36 = vcombine.high %v1049_v31, %v1053_v33 }
 0x26e   :  { %v395_v46 = vmax.f32 %v391_v35, %v393_v41  ;;  %v3949_v35 = vcombine.low %v1049_v31, %v1053_v33  ;;  %v1056_v41 = vld [vmem:[#allocation10 + $0x200] sm:$0xff] }
 0x26f   :  { %v396_v51 = vpack.c.bf16 %v394_v44, %v394_v44  ;;  %v1060_v44 = vld [vmem:[#allocation10 + $0x220] sm:$0xff] }
 0x270   :  { %v397_v50 = vpack.c.bf16 %v395_v46, %v395_v46  ;;  %v3956_v46 = vcombine.high %v1056_v41, %v1060_v44  ;;  %v3955_v48 = vcombine.low %v1056_v41, %v1060_v44  ;;  %v1116_v33 = vld [vmem:[#allocation10 + $0x3e0] sm:$0xff]  ;;  %v1117_v41 = vld [vmem:[#allocation10 + $0x3e8] sm:$0xff] }
 0x272   :  { %814 = vmatprep.mubr.bf16.mxu0 %v397_v50  ;;  %855 = vmatprep.mubr.bf16.mxu1 %v397_v50  ;;  %v3958_v50 = vcombine.high %v1057_v45, %v1061_v47  ;;  %v4938_v47 = vld [vmem:[#allocation10 + $0x420] sm:$0xff] }
 0x273   :  { %815 = vmatmul.mubr.bf16.vlgmr.msra.gmra.mrb[4].mxu0 %v396_v51  ;;  %856 = vmatmul.mubr.bf16.vlgmr.msra.gmra.mrb[4].mxu1 %v396_v51  ;;  %v1064_v51 = vld [vmem:[#allocation10 + $0x240] sm:$0xff] }
 0x274   :  { %2529 = vmatpush1.bf16.msra.mxu0 %v3891_v40  ;;  %2611 = vmatpush1.bf16.msra.mxu1 %v3893_v43  ;;  %v3916_v40 = vcombine.high %v1016_v37, %v1020_v38  ;;  %v3915_v43 = vcombine.low %v1016_v37, %v1020_v38 }
 0x275   :  { %2530 = vmatprep.subr.bf16.mxu0 %v3900_v52  ;;  %2612 = vmatprep.subr.bf16.mxu1 %v3902_v53  ;;  %v1068_v52 = vld [vmem:[#allocation10 + $0x260] sm:$0xff]  ;;  %v1065_v53 = vld [vmem:[#allocation10 + $0x248] sm:$0xff] }
 0x276   :  { %v3963_v56 = vcombine.low %v1064_v51, %v1068_v52 }
 0x278   :  { %2531 = vmatpush1.bf16.msra.mxu0 %v3899_v54  ;;  %2613 = vmatpush1.bf16.msra.mxu1 %v3901_v55  ;;  %v3964_v54 = vcombine.high %v1064_v51, %v1068_v52  ;;  %v1069_v55 = vld [vmem:[#allocation10 + $0x268] sm:$0xff] }
 0x279   :  { %2532 = vmatprep.subr.bf16.mxu0 %v3908_v59  ;;  %2614 = vmatprep.subr.bf16.mxu1 %v3910_v63  ;;  %v3965_v57 = vcombine.low %v1065_v53, %v1069_v55  ;;  %v3966_v58 = vcombine.high %v1065_v53, %v1069_v55  ;;  %v1072_v59 = vld [vmem:[#allocation10 + $0x280] sm:$0xff]  ;;  %v1077_v63 = vld [vmem:[#allocation10 + $0x2a8] sm:$0xff] }
 0x27a   :  { %v3971_v37 = vcombine.low %v1072_v59, %v1076_v60 }
 0x27c   :  { %2533 = vmatpush1.bf16.msra.mxu0 %v3907_v61  ;;  %2615 = vmatpush1.bf16.msra.mxu1 %v3909_v62  ;;  %v1073_v61 = vld [vmem:[#allocation10 + $0x288] sm:$0xff]  ;;  %v3972_v62 = vcombine.high %v1072_v59, %v1076_v60 }
 0x27d   :  { %2534 = vmatprep.subr.bf16.mxu0 %v3916_v40  ;;  %2616 = vmatprep.subr.bf16.mxu1 %v3918_v1  ;;  %v3973_v38 = vcombine.low %v1073_v61, %v1077_v63  ;;  %v3974_v39 = vcombine.high %v1073_v61, %v1077_v63  ;;  %v1080_v40 = vld [vmem:[#allocation10 + $0x2c0] sm:$0xff]  ;;  %v1085_v1 = vld [vmem:[#allocation10 + $0x2e8] sm:$0xff] }
 0x27e   :  { %v3979_v2 = vcombine.low %v1080_v40, %v1084_v42 }
 0x280   :  { %2535 = vmatpush1.bf16.msra.mxu0 %v3915_v43  ;;  %2617 = vmatpush1.bf16.msra.mxu1 %v3917_v0  ;;  %v1081_v43 = vld [vmem:[#allocation10 + $0x2c8] sm:$0xff]  ;;  %v3980_v0 = vcombine.high %v1080_v40, %v1084_v42 }
 0x281   :  { %2536 = vmatprep.subr.bf16.mxu0 %v3924_v5  ;;  %2618 = vmatprep.subr.bf16.mxu1 %v3926_v9  ;;  %v3981_v3 = vcombine.low %v1081_v43, %v1085_v1  ;;  %v3982_v4 = vcombine.high %v1081_v43, %v1085_v1  ;;  %v1088_v5 = vld [vmem:[#allocation10 + $0x300] sm:$0xff]  ;;  %v1093_v9 = vld [vmem:[#allocation10 + $0x328] sm:$0xff] }
 0x282   :  { %v3987_v10 = vcombine.low %v1088_v5, %v1092_v6 }
 0x284   :  { %2537 = vmatpush1.bf16.msra.mxu0 %v3923_v7  ;;  %2619 = vmatpush1.bf16.msra.mxu1 %v3925_v8  ;;  %v1089_v7 = vld [vmem:[#allocation10 + $0x308] sm:$0xff]  ;;  %v3988_v8 = vcombine.high %v1088_v5, %v1092_v6 }
 0x285   :  { %2538 = vmatprep.subr.bf16.mxu0 %v3932_v13  ;;  %2620 = vmatprep.subr.bf16.mxu1 %v3934_v17  ;;  %v3989_v11 = vcombine.low %v1089_v7, %v1093_v9  ;;  %v3990_v12 = vcombine.high %v1089_v7, %v1093_v9  ;;  %v1096_v13 = vld [vmem:[#allocation10 + $0x340] sm:$0xff]  ;;  %v1101_v17 = vld [vmem:[#allocation10 + $0x368] sm:$0xff] }
 0x286   :  { %v3995_v18 = vcombine.low %v1096_v13, %v1100_v14 }
 0x288   :  { %2539 = vmatpush1.bf16.msra.mxu0 %v3931_v15  ;;  %2621 = vmatpush1.bf16.msra.mxu1 %v3933_v16  ;;  %v1097_v15 = vld [vmem:[#allocation10 + $0x348] sm:$0xff]  ;;  %v3996_v16 = vcombine.high %v1096_v13, %v1100_v14 }
 0x289   :  { %2540 = vmatprep.subr.bf16.mxu0 %v3940_v22  ;;  %2622 = vmatprep.subr.bf16.mxu1 %v3942_v27  ;;  %v3997_v19 = vcombine.low %v1097_v15, %v1101_v17  ;;  %v3998_v20 = vcombine.high %v1097_v15, %v1101_v17  ;;  %v1104_v22 = vld [vmem:[#allocation10 + $0x380] sm:$0xff]  ;;  %v1109_v27 = vld [vmem:[#allocation10 + $0x3a8] sm:$0xff] }
 0x28a   :  { %v4003_v29 = vcombine.low %v1104_v22, %v1108_v23 }
 0x28c   :  { %2541 = vmatpush1.bf16.msra.mxu0 %v3939_v24  ;;  %2623 = vmatpush1.bf16.msra.mxu1 %v3941_v25  ;;  %v1105_v24 = vld [vmem:[#allocation10 + $0x388] sm:$0xff]  ;;  %v4004_v25 = vcombine.high %v1104_v22, %v1108_v23 }
 0x28d   :  { %2542 = vmatprep.subr.bf16.mxu0 %v3948_v32  ;;  %2624 = vmatprep.subr.bf16.mxu1 %v3950_v36  ;;  %v4005_v30 = vcombine.low %v1105_v24, %v1109_v27  ;;  %v4006_v31 = vcombine.high %v1105_v24, %v1109_v27  ;;  %v1112_v32 = vld [vmem:[#allocation10 + $0x3c0] sm:$0xff] }
 0x28e   :  { %v4012_v36 = vcombine.high %v1112_v32, %v1116_v33 }
 0x290   :  { %2543 = vmatpush1.bf16.msra.mxu0 %v3947_v34  ;;  %2625 = vmatpush1.bf16.msra.mxu1 %v3949_v35  ;;  %v1113_v34 = vld [vmem:[#allocation10 + $0x3c8] sm:$0xff]  ;;  %v4011_v35 = vcombine.low %v1112_v32, %v1116_v33 }
 0x291   :  { %2544 = vmatprep.subr.bf16.mxu0 %v3956_v46  ;;  %2626 = vmatprep.subr.bf16.mxu1 %v3958_v50  ;;  %v4014_v44 = vcombine.high %v1113_v34, %v1117_v41  ;;  %v4013_v45 = vcombine.low %v1113_v34, %v1117_v41  ;;  %v4936_v46 = vld [vmem:[#allocation10 + $0x400] sm:$0xff]  ;;  %v4944_v50 = vld [vmem:[#allocation10 + $0x428] sm:$0xff] }
 0x292   :  { %v4019_v51 = vcombine.low %v4936_v46, %v4938_v47 }
 0x294   :  { %2545 = vmatpush1.bf16.msra.mxu0 %v3955_v48  ;;  %2627 = vmatpush1.bf16.msra.mxu1 %v3957_v49  ;;  %v4940_v48 = vld [vmem:[#allocation10 + $0x408] sm:$0xff]  ;;  %v4020_v49 = vcombine.high %v4936_v46, %v4938_v47 }
 0x295   :  { %2546 = vmatprep.subr.bf16.mxu0 %v3964_v54  ;;  %2628 = vmatprep.subr.bf16.mxu1 %v3966_v58  ;;  %v4021_v52 = vcombine.low %v4940_v48, %v4944_v50  ;;  %v4022_v53 = vcombine.high %v4940_v48, %v4944_v50 }
 0x298   :  { %2547 = vmatpush1.bf16.msra.mxu0 %v3963_v56  ;;  %2629 = vmatpush1.bf16.msra.mxu1 %v3965_v57 }
 0x299   :  { %2548 = vmatprep.subr.bf16.mxu0 %v3972_v62  ;;  %2630 = vmatprep.subr.bf16.mxu1 %v3974_v39 }
 0x29c   :  { %2549 = vmatpush1.bf16.msra.mxu0 %v3971_v37  ;;  %2631 = vmatpush1.bf16.msra.mxu1 %v3973_v38 }
 0x29d   :  { %2550 = vmatprep.subr.bf16.mxu0 %v3980_v0  ;;  %2632 = vmatprep.subr.bf16.mxu1 %v3982_v4 }
 0x2a0   :  { %2551 = vmatpush1.bf16.msra.mxu0 %v3979_v2  ;;  %2633 = vmatpush1.bf16.msra.mxu1 %v3981_v3 }
 0x2a1   :  { %2552 = vmatprep.subr.bf16.mxu0 %v3988_v8  ;;  %2634 = vmatprep.subr.bf16.mxu1 %v3990_v12 }
 0x2a4   :  { %2553 = vmatpush1.bf16.msra.mxu0 %v3987_v10  ;;  %2635 = vmatpush1.bf16.msra.mxu1 %v3989_v11 }
 0x2a5   :  { %2554 = vmatprep.subr.bf16.mxu0 %v3996_v16  ;;  %2636 = vmatprep.subr.bf16.mxu1 %v3998_v20 }
 0x2a8   :  { %2555 = vmatpush1.bf16.msra.mxu0 %v3995_v18  ;;  %2637 = vmatpush1.bf16.msra.mxu1 %v3997_v19 }
 0x2a9   :  { %2556 = vmatprep.subr.bf16.mxu0 %v4004_v25  ;;  %2638 = vmatprep.subr.bf16.mxu1 %v4006_v31 }
 0x2ac   :  { %2557 = vmatpush1.bf16.msra.mxu0 %v4003_v29  ;;  %2639 = vmatpush1.bf16.msra.mxu1 %v4005_v30 }
 0x2ad   :  { %2558 = vmatprep.subr.bf16.mxu0 %v4012_v36  ;;  %2640 = vmatprep.subr.bf16.mxu1 %v4014_v44 }
 0x2b0   :  { %2559 = vmatpush1.bf16.msra.mxu0 %v4011_v35  ;;  %2641 = vmatpush1.bf16.msra.mxu1 %v4013_v45 }
 0x2b1   :  { %2569 = vmatprep.subr.bf16.mxu0 %v4020_v49  ;;  %2651 = vmatprep.subr.bf16.mxu1 %v4022_v53 }
 0x346   :  { %v816_v54 = vpop.f32.mrb[4].mxu0  ;;  %v857_v55 = vpop.f32.mrb[4].mxu1 }
 0x347   :  { %v864_v56 = vrot.slane %v816_v54, 4  ;;  %v876_v57 = vrot.slane %v857_v55, 4  ;;  %v818_v58 = vpop.f32.mrb[5].mxu0  ;;  %v859_v59 = vpop.f32.mrb[5].mxu1 }
 0x348   :  { %v870_v60 = vrot.slane %v818_v58, 4  ;;  %v882_v61 = vrot.slane %v859_v59, 4  ;;  %v820_v62 = vpop.f32.mrb[6].mxu0  ;;  %v861_v63 = vpop.f32.mrb[6].mxu1 }
 0x349   :  { %v865_v37 = vadd.f32 %v864_v56, %v816_v54  ;;  %v877_v38 = vadd.f32 %v876_v57, %v857_v55  ;;  %v821_v39 = vpop.f32.mrb[7].mxu0  ;;  %v862_v40 = vpop.f32.mrb[7].mxu1 }
 0x34a   :  { %v871_v42 = vadd.f32 %v870_v60, %v818_v58  ;;  %v883_v43 = vadd.f32 %v882_v61, %v859_v59 }
 0x34b   :  { %v866_v0 = vrot.slane %v865_v37, 2  ;;  %v878_v1 = vrot.slane %v877_v38, 2 }
 0x34c   :  { %v872_v2 = vrot.slane %v871_v42, 2  ;;  %v884_v3 = vrot.slane %v883_v43, 2 }
 0x34d   :  { %v867_v4 = vadd.f32 %v866_v0, %v865_v37  ;;  %v879_v5 = vadd.f32 %v878_v1, %v877_v38 }
 0x34e   :  { %v873_v6 = vadd.f32 %v872_v2, %v871_v42  ;;  %v885_v7 = vadd.f32 %v884_v3, %v883_v43 }
 0x34f   :  { %v868_v8 = vrot.slane %v867_v4, 1  ;;  %v880_v9 = vrot.slane %v879_v5, 1 }
 0x350   :  { %v874_v10 = vrot.slane %v873_v6, 1  ;;  %v886_v11 = vrot.slane %v885_v7, 1 }
 0x351   :  { %v869_v12 = vadd.f32 %v868_v8, %v867_v4  ;;  %v881_v13 = vadd.f32 %v880_v9, %v879_v5  ;;  %v942_v5 = vsub.s32 3, %v4900_v26  ;;  %v122_v9 = vld [vmem:[#allocation13 + $0x18] sm:$0xff] }
 0x352   :  { %v875_v14 = vadd.f32 %v874_v10, %v873_v6  ;;  %v887_v15 = vadd.f32 %v886_v11, %v885_v7  ;;  %v962_v6 = vsub.s32 4, %v4900_v26  ;;  %v121_v7 = vld [vmem:[#allocation13 + $0x10] sm:$0xff] }
 0x353   :  { %v888_v16 = vmul.f32 0.125, %v869_v12  ;;  %v890_v17 = vmul.f32 0.125, %v881_v13  ;;  %v943_v8 = vrot.slane %v4903_v28, %v942_v5  ;;  %v951_v11 = vrot.slane %v121_v7, %v942_v5 }
 0x354   :  { %v889_v18 = vmul.f32 0.125, %v875_v14  ;;  %v891_v19 = vmul.f32 0.125, %v887_v15  ;;  %v963_v14 = vrot.slane %v4903_v28, %v962_v6  ;;  %v947_v15 = vrot.slane %v4924_v21, %v942_v5 }
 0x355   :  { %v892_v20 = vsub.f32 %v816_v54, %v888_v16  ;;  %v894_v22 = vsub.f32 %v857_v55, %v890_v17 }
 0x356   :  { %v893_v23 = vsub.f32 %v818_v58, %v889_v18  ;;  %v895_v24 = vsub.f32 %v859_v59, %v891_v19  ;;  %v971_v18 = vrot.slane %v121_v7, %v962_v6  ;;  %v955_v19 = vrot.slane %v122_v9, %v942_v5 }
 0x357   :  { %v896_v25 = vmul.f32 %v892_v20, %v892_v20  ;;  %v898_v27 = vmul.f32 %v894_v22, %v894_v22 }
 0x358   :  { %v897_v29 = vmul.f32 %v893_v23, %v893_v23  ;;  %v899_v30 = vmul.f32 %v895_v24, %v895_v24 }
 0x359   :  { %v900_v31 = vrot.slane %v896_v25, 4  ;;  %v912_v32 = vrot.slane %v898_v27, 4 }
 0x35a   :  { %v906_v33 = vrot.slane %v897_v29, 4  ;;  %v918_v34 = vrot.slane %v899_v30, 4 }
 0x35b   :  { %v901_v35 = vadd.f32 %v900_v31, %v896_v25  ;;  %v913_v36 = vadd.f32 %v912_v32, %v898_v27 }
 0x35c   :  { %v907_v41 = vadd.f32 %v906_v33, %v897_v29  ;;  %v919_v44 = vadd.f32 %v918_v34, %v899_v30  ;;  %v967_v30 = vrot.slane %v4924_v21, %v962_v6  ;;  %v975_v33 = vrot.slane %v122_v9, %v962_v6  ;;  %v1133_v21 = vld [vmem:[#allocation10 + $0x468] sm:$0xff]  ;;  %v1160_v9 = vld [vmem:[#allocation10 + $0x540] sm:$0xff] }
 0x35d   :  { %v902_v45 = vrot.slane %v901_v35, 2  ;;  %v914_v49 = vrot.slane %v913_v36, 2 }
 0x35e   :  { %v908_v53 = vrot.slane %v907_v41, 2  ;;  %v920_v56 = vrot.slane %v919_v44, 2 }
 0x35f   :  { %v903_v54 = vadd.f32 %v902_v45, %v901_v35  ;;  %v915_v55 = vadd.f32 %v914_v49, %v913_v36 }
 0x360   :  { %v909_v57 = vadd.f32 %v908_v53, %v907_v41  ;;  %v921_v58 = vadd.f32 %v920_v56, %v919_v44  ;;  %v1128_v56 = vld [vmem:[#allocation10 + $0x440] sm:$0xff] }
 0x361   :  { %v904_v59 = vrot.slane %v903_v54, 1  ;;  %v916_v60 = vrot.slane %v915_v55, 1 }
 0x362   :  { %v910_v61 = vrot.slane %v909_v57, 1  ;;  %v922_v62 = vrot.slane %v921_v58, 1 }
 0x363   :  { %v905_v63 = vadd.f32 %v904_v59, %v903_v54  ;;  %v917_v37 = vadd.f32 %v916_v60, %v915_v55  ;;  %v1129_v55 = vld [vmem:[#allocation10 + $0x448] sm:$0xff] }
 0x364   :  { %v911_v38 = vadd.f32 %v910_v61, %v909_v57  ;;  %v923_v39 = vadd.f32 %v922_v62, %v921_v58  ;;  %v1136_v58 = vld [vmem:[#allocation10 + $0x480] sm:$0xff]  ;;  %v4030_v60 = vcombine.high %v1129_v55, %v1133_v21  ;;  %v1137_v62 = vld [vmem:[#allocation10 + $0x488] sm:$0xff] }
 0x365   :  { %v924_v40 = vmul.f32 0.125, %v905_v63  ;;  %v926_v42 = vmul.f32 0.125, %v917_v37  ;;  %v1140_v61 = vld [vmem:[#allocation10 + $0x4a0] sm:$0xff]  ;;  %v1141_v63 = vld [vmem:[#allocation10 + $0x4a8] sm:$0xff] }
 0x366   :  { %v925_v43 = vmul.f32 0.125, %v911_v38  ;;  %v927_v0 = vmul.f32 0.125, %v923_v39  ;;  %v4029_v39 = vcombine.low %v1129_v55, %v1133_v21  ;;  %v4035_v46 = vcombine.low %v1136_v58, %v1140_v61  ;;  %v1192_v21 = vld [vmem:[#allocation10 + $0x640] sm:$0xff] }
 0x367   :  { %v928_v1 = vadd.f32 0.8, %v924_v40  ;;  %v930_v2 = vadd.f32 0.8, %v926_v42  ;;  %v4036_v40 = vcombine.high %v1136_v58, %v1140_v61  ;;  %v4038_v42 = vcombine.high %v1137_v62, %v1141_v63  ;;  %v1196_v58 = vld [vmem:[#allocation10 + $0x660] sm:$0xff] }
 0x368   :  { %v929_v3 = vadd.f32 0.8, %v925_v43  ;;  %v931_v4 = vadd.f32 0.8, %v927_v0  ;;  %v1144_v43 = vld [vmem:[#allocation10 + $0x4c0] sm:$0xff]  ;;  %v4037_v47 = vcombine.low %v1137_v62, %v1141_v63  ;;  %v4092_v63 = vcombine.high %v1192_v21, %v1196_v58 }
 0x369   :  { %4535 = vrsqrt.f32 %v928_v1  ;;  %v1148_v0 = vld [vmem:[#allocation10 + $0x4e0] sm:$0xff]  ;;  %v1145_v1 = vld [vmem:[#allocation10 + $0x4c8] sm:$0xff] }
 0x36a   :  { %4537 = vrsqrt.f32 %v930_v2  ;;  %v1149_v2 = vld [vmem:[#allocation10 + $0x4e8] sm:$0xff]  ;;  %v4044_v48 = vcombine.high %v1144_v43, %v1148_v0  ;;  %v4043_v5 = vcombine.low %v1144_v43, %v1148_v0  ;;  %v4091_v0 = vcombine.low %v1192_v21, %v1196_v58  ;;  %v995_v21 = vld [vmem:[#allocation10 + $0x18] sm:$0xff] }
 0x36b   :  { %4539 = vrsqrt.f32 %v929_v3  ;;  %v4046_v50 = vcombine.high %v1145_v1, %v1149_v2  ;;  %v1153_v3 = vld [vmem:[#allocation10 + $0x508] sm:$0xff]  ;;  %v4045_v6 = vcombine.low %v1145_v1, %v1149_v2  ;;  %v999_v58 = vld [vmem:[#allocation10 + $0x38] sm:$0xff] }
 0x36c   :  { %4541 = vrsqrt.f32 %v931_v4  ;;  %v1157_v4 = vld [vmem:[#allocation10 + $0x528] sm:$0xff] }
 0x36d   :  { %v1205_v43 = vld [vmem:[#allocation10 + $0x6a8] sm:$0xff] }
 0x373   :  { %v4536_v10 = vpop.eup %4535 }
 0x374   :  { %v4538_v12 = vpop.eup %4537  ;;  %v936_v13 = vmul.f32 %v4536_v10, %v892_v20  ;;  %v1164_v10 = vld [vmem:[#allocation10 + $0x560] sm:$0xff] }
 0x375   :  { %v4540_v16 = vpop.eup %4539  ;;  %v938_v17 = vmul.f32 %v4538_v12, %v894_v22  ;;  %v1165_v12 = vld [vmem:[#allocation10 + $0x568] sm:$0xff] }
 0x376   :  { %v4542_v25 = vpop.eup %4541  ;;  %v956_v27 = vmul.f32 %v943_v8, %v936_v13  ;;  %v937_v29 = vmul.f32 %v4540_v16, %v893_v23  ;;  %v1132_v23 = vld [vmem:[#allocation10 + $0x460] sm:$0xff]  ;;  %v4054_v8 = vcombine.high %v1153_v3, %v1157_v4 }
 0x377   :  { %v958_v31 = vmul.f32 %v951_v11, %v938_v17  ;;  %v939_v32 = vmul.f32 %v4542_v25, %v895_v24  ;;  %v4028_v59 = vcombine.high %v1128_v56, %v1132_v23  ;;  %v4027_v38 = vcombine.low %v1128_v56, %v1132_v23  ;;  %v1161_v11 = vld [vmem:[#allocation10 + $0x548] sm:$0xff]  ;;  %v1168_v17 = vld [vmem:[#allocation10 + $0x580] sm:$0xff] }
 0x378   :  { %v976_v34 = vadd.f32 %v963_v14, %v956_v27  ;;  %v957_v35 = vmul.f32 %v947_v15, %v937_v29  ;;  %v4053_v14 = vcombine.low %v1153_v3, %v1157_v4  ;;  %v4060_v15 = vcombine.high %v1160_v9, %v1164_v10  ;;  %v1173_v25 = vld [vmem:[#allocation10 + $0x5a8] sm:$0xff] }
 0x379   :  { %v4958_v36 = vadd.f32 %v971_v18, %v958_v31  ;;  %v959_v20 = vmul.f32 %v955_v19, %v939_v32  ;;  %v4062_v16 = vcombine.high %v1161_v11, %v1165_v12  ;;  %v1172_v18 = vld [vmem:[#allocation10 + $0x5a0] sm:$0xff]  ;;  %v1169_v19 = vld [vmem:[#allocation10 + $0x588] sm:$0xff]  ;;  %v4059_v27 = vcombine.low %v1160_v9, %v1164_v10 }
 0x37a   :  { %v977_v28 = vadd.f32 %v967_v30, %v957_v35  ;;  %v980_v41 = vmul.f32 0.2, %v976_v34  ;;  %v4061_v29 = vcombine.low %v1161_v11, %v1165_v12  ;;  %v4068_v30 = vcombine.high %v1168_v17, %v1172_v18  ;;  %v1176_v32 = vld [vmem:[#allocation10 + $0x5c0] sm:$0xff]  ;;  %v1181_v35 = vld [vmem:[#allocation10 + $0x5e8] sm:$0xff] }
 0x37b   :  { %v979_v44 = vadd.f32 %v975_v33, %v959_v20  ;;  %v4070_v31 = vcombine.high %v1169_v19, %v1173_v25  ;;  %v1180_v33 = vld [vmem:[#allocation10 + $0x5e0] sm:$0xff]  ;;  %v4067_v20 = vcombine.low %v1168_v17, %v1172_v18  ;;  %v1221_v9 = vld [vmem:[#allocation10 + $0x728] sm:$0xff] }
 0x37c   :  { %v981_v45 = vmul.f32 0.2, %v977_v28  ;;  %v984_v22 = vmax.f32 %v976_v34, %v980_v41  ;;  %v1177_v34 = vld [vmem:[#allocation10 + $0x5c8] sm:$0xff]  ;;  %v4076_v41 = vcombine.high %v1176_v32, %v1180_v33  ;;  %v4075_v56 = vcombine.low %v1176_v32, %v1180_v33 }
 0x37d   :  { %v983_v49 = vmul.f32 0.2, %v979_v44  ;;  %v1229_v17 = vld [vmem:[#allocation10 + $0x768] sm:$0xff] }
 0x37e   :  { %v985_v53 = vmax.f32 %v977_v28, %v981_v45  ;;  %v4962_v24 = vpack.c.bf16 %v984_v22, %v984_v22  ;;  %v4069_v28 = vcombine.low %v1169_v19, %v1173_v25  ;;  %v1184_v45 = vld [vmem:[#allocation10 + $0x600] sm:$0xff]  ;;  %v1237_v32 = vld [vmem:[#allocation10 + $0x7a8] sm:$0xff] }
 0x37f   :  { %v987_v54 = vmax.f32 %v979_v44, %v983_v49  ;;  %v4078_v44 = vcombine.high %v1177_v34, %v1181_v35  ;;  %v1188_v22 = vld [vmem:[#allocation10 + $0x620] sm:$0xff]  ;;  %v1185_v49 = vld [vmem:[#allocation10 + $0x608] sm:$0xff] }
 0x380   :  { %v4960_v57 = vpack.c.bf16 %v985_v53, %v985_v53  ;;  %v1189_v53 = vld [vmem:[#allocation10 + $0x628] sm:$0xff]  ;;  %v4084_v23 = vcombine.high %v1184_v45, %v1188_v22  ;;  %v4083_v61 = vcombine.low %v1184_v45, %v1188_v22 }
 0x381   :  { %v4968_v37 = vpack.c.bf16 %v987_v54, %v987_v54  ;;  %v4077_v54 = vcombine.low %v1177_v34, %v1181_v35  ;;  %v4086_v55 = vcombine.high %v1185_v49, %v1189_v53  ;;  %v4085_v62 = vcombine.low %v1185_v49, %v1189_v53  ;;  %v1245_v45 = vld [vmem:[#allocation10 + $0x7e8] sm:$0xff] }
 0x382   :  { %2560 = vmatprep.mubr.bf16.mxu0 %v4960_v57  ;;  %2642 = vmatprep.mubr.bf16.mxu1 %v4960_v57 }
 0x383   :  { %2561 = vmatmul.mubr.bf16.vlgmr.msra.gmra.mrb[8].mxu0 %v4962_v24  ;;  %2643 = vmatmul.mubr.bf16.vlgmr.msra.gmra.mrb[8].mxu1 %v4962_v24 }
 0x384   :  { %2570 = vmatpush1.bf16.msra.mxu0 %v4019_v51  ;;  %2652 = vmatpush1.bf16.msra.mxu1 %v4021_v52  ;;  %v1152_v51 = vld [vmem:[#allocation10 + $0x500] sm:$0xff] }
 0x385   :  { %2601 = vmatprep.mubr.bf16.mxu0 %v4968_v37  ;;  %2683 = vmatprep.mubr.bf16.mxu1 %v4968_v37  ;;  %v1156_v52 = vld [vmem:[#allocation10 + $0x520] sm:$0xff] }
 0x386   :  { %2571 = vmatprep.subr.bf16.mxu0 %v4028_v59  ;;  %2653 = vmatprep.subr.bf16.mxu1 %v4030_v60  ;;  %v4052_v7 = vcombine.high %v1152_v51, %v1156_v52  ;;  %v4051_v13 = vcombine.low %v1152_v51, %v1156_v52  ;;  %v1193_v59 = vld [vmem:[#allocation10 + $0x648] sm:$0xff] }
 0x387   :  { %v1197_v60 = vld [vmem:[#allocation10 + $0x668] sm:$0xff] }
 0x388   :  { %2572 = vmatpush1.bf16.msra.mxu0 %v4027_v38  ;;  %2654 = vmatpush1.bf16.msra.mxu1 %v4029_v39  ;;  %v4094_v38 = vcombine.high %v1193_v59, %v1197_v60  ;;  %v1200_v39 = vld [vmem:[#allocation10 + $0x680] sm:$0xff]  ;;  %v4093_v1 = vcombine.low %v1193_v59, %v1197_v60  ;;  %v1213_v51 = vld [vmem:[#allocation10 + $0x6e8] sm:$0xff] }
 0x389   :  { %2573 = vmatprep.subr.bf16.mxu0 %v4036_v40  ;;  %2655 = vmatprep.subr.bf16.mxu1 %v4038_v42  ;;  %v1204_v40 = vld [vmem:[#allocation10 + $0x6a0] sm:$0xff]  ;;  %v1201_v42 = vld [vmem:[#allocation10 + $0x688] sm:$0xff] }
 0x38a   :  { %v4100_v2 = vcombine.high %v1200_v39, %v1204_v40  ;;  %v4099_v52 = vcombine.low %v1200_v39, %v1204_v40  ;;  %v4101_v3 = vcombine.low %v1201_v42, %v1205_v43  ;;  %v1006_v39 = vld [vmem:[#allocation10 + $0x70] sm:$0xff]  ;;  %v1003_v40 = vld [vmem:[#allocation10 + $0x58] sm:$0xff] }
 0x38c   :  { %2574 = vmatpush1.bf16.msra.mxu0 %v4035_v46  ;;  %2656 = vmatpush1.bf16.msra.mxu1 %v4037_v47  ;;  %v4102_v46 = vcombine.high %v1201_v42, %v1205_v43  ;;  %v1208_v47 = vld [vmem:[#allocation10 + $0x6c0] sm:$0xff]  ;;  %v1007_v42 = vld [vmem:[#allocation10 + $0x78] sm:$0xff] }
 0x38d   :  { %2575 = vmatprep.subr.bf16.mxu0 %v4044_v48  ;;  %2657 = vmatprep.subr.bf16.mxu1 %v4046_v50  ;;  %v1212_v48 = vld [vmem:[#allocation10 + $0x6e0] sm:$0xff]  ;;  %v1209_v50 = vld [vmem:[#allocation10 + $0x6c8] sm:$0xff] }
 0x38e   :  { %v4108_v4 = vcombine.high %v1208_v47, %v1212_v48  ;;  %v4107_v10 = vcombine.low %v1208_v47, %v1212_v48  ;;  %v4109_v11 = vcombine.low %v1209_v50, %v1213_v51  ;;  %v1010_v47 = vld [vmem:[#allocation10 + $0x90] sm:$0xff] }
 0x38f   :  { %v1014_v48 = vld [vmem:[#allocation10 + $0xb0] sm:$0xff] }
 0x390   :  { %2576 = vmatpush1.bf16.msra.mxu0 %v4043_v5  ;;  %2658 = vmatpush1.bf16.msra.mxu1 %v4045_v6  ;;  %v4110_v5 = vcombine.high %v1209_v50, %v1213_v51  ;;  %v1216_v6 = vld [vmem:[#allocation10 + $0x700] sm:$0xff]  ;;  %v1015_v50 = vld [vmem:[#allocation10 + $0xb8] sm:$0xff] }
 0x391   :  { %2577 = vmatprep.subr.bf16.mxu0 %v4052_v7  ;;  %2659 = vmatprep.subr.bf16.mxu1 %v4054_v8  ;;  %v1220_v7 = vld [vmem:[#allocation10 + $0x720] sm:$0xff]  ;;  %v1217_v8 = vld [vmem:[#allocation10 + $0x708] sm:$0xff] }
 0x392   :  { %v4116_v12 = vcombine.high %v1216_v6, %v1220_v7  ;;  %v4115_v18 = vcombine.low %v1216_v6, %v1220_v7  ;;  %v4117_v19 = vcombine.low %v1217_v8, %v1221_v9  ;;  %v1022_v6 = vld [vmem:[#allocation10 + $0xf0] sm:$0xff]  ;;  %v1019_v7 = vld [vmem:[#allocation10 + $0xd8] sm:$0xff] }
 0x394   :  { %2578 = vmatpush1.bf16.msra.mxu0 %v4051_v13  ;;  %2660 = vmatpush1.bf16.msra.mxu1 %v4053_v14  ;;  %v4118_v13 = vcombine.high %v1217_v8, %v1221_v9  ;;  %v1224_v14 = vld [vmem:[#allocation10 + $0x740] sm:$0xff]  ;;  %v1023_v8 = vld [vmem:[#allocation10 + $0xf8] sm:$0xff]  ;;  %v3911_v9 = vcombine.low %v1010_v47, %v1014_v48 }
 0x395   :  { %2579 = vmatprep.subr.bf16.mxu0 %v4060_v15  ;;  %2661 = vmatprep.subr.bf16.mxu1 %v4062_v16  ;;  %v1228_v15 = vld [vmem:[#allocation10 + $0x760] sm:$0xff]  ;;  %v1225_v16 = vld [vmem:[#allocation10 + $0x748] sm:$0xff] }
 0x396   :  { %v4124_v25 = vcombine.high %v1224_v14, %v1228_v15  ;;  %v4123_v33 = vcombine.low %v1224_v14, %v1228_v15  ;;  %v4125_v34 = vcombine.low %v1225_v16, %v1229_v17  ;;  %v1030_v14 = vld [vmem:[#allocation10 + $0x130] sm:$0xff]  ;;  %v1031_v15 = vld [vmem:[#allocation10 + $0x138] sm:$0xff] }
 0x398   :  { %2580 = vmatpush1.bf16.msra.mxu0 %v4059_v27  ;;  %2662 = vmatpush1.bf16.msra.mxu1 %v4061_v29  ;;  %v4126_v27 = vcombine.high %v1225_v16, %v1229_v17  ;;  %v1232_v29 = vld [vmem:[#allocation10 + $0x780] sm:$0xff]  ;;  %v3921_v17 = vcombine.low %v1019_v7, %v1023_v8 }
 0x399   :  { %2581 = vmatprep.subr.bf16.mxu0 %v4068_v30  ;;  %2663 = vmatprep.subr.bf16.mxu1 %v4070_v31  ;;  %v1236_v30 = vld [vmem:[#allocation10 + $0x7a0] sm:$0xff]  ;;  %v1233_v31 = vld [vmem:[#allocation10 + $0x788] sm:$0xff] }
 0x39a   :  { %v4132_v35 = vcombine.high %v1232_v29, %v1236_v30  ;;  %v4131_v22 = vcombine.low %v1232_v29, %v1236_v30  ;;  %v4133_v49 = vcombine.low %v1233_v31, %v1237_v32  ;;  %v1035_v29 = vld [vmem:[#allocation10 + $0x158] sm:$0xff] }
 0x39b   :  { %v1039_v30 = vld [vmem:[#allocation10 + $0x178] sm:$0xff] }
 0x39c   :  { %2582 = vmatpush1.bf16.msra.mxu0 %v4067_v20  ;;  %2664 = vmatpush1.bf16.msra.mxu1 %v4069_v28  ;;  %v4134_v20 = vcombine.high %v1233_v31, %v1237_v32  ;;  %v1240_v28 = vld [vmem:[#allocation10 + $0x7c0] sm:$0xff] }
 0x39d   :  { %2583 = vmatprep.subr.bf16.mxu0 %v4076_v41  ;;  %2665 = vmatprep.subr.bf16.mxu1 %v4078_v44  ;;  %v1244_v41 = vld [vmem:[#allocation10 + $0x7e0] sm:$0xff]  ;;  %v1241_v44 = vld [vmem:[#allocation10 + $0x7c8] sm:$0xff] }
 0x39e   :  { %v4140_v53 = vcombine.high %v1240_v28, %v1244_v41  ;;  %v4139_v59 = vcombine.low %v1240_v28, %v1244_v41  ;;  %v4141_v60 = vcombine.low %v1241_v44, %v1245_v45  ;;  %v1043_v28 = vld [vmem:[#allocation10 + $0x198] sm:$0xff] }
 0x39f   :  { %v1047_v41 = vld [vmem:[#allocation10 + $0x1b8] sm:$0xff] }
 0x3a0   :  { %2584 = vmatpush1.bf16.msra.mxu0 %v4075_v56  ;;  %2666 = vmatpush1.bf16.msra.mxu1 %v4077_v54  ;;  %v4142_v56 = vcombine.high %v1241_v44, %v1245_v45  ;;  %v982_v54 = vmul.f32 0.2, %v4958_v36  ;;  %v3937_v45 = vcombine.low %v1035_v29, %v1039_v30 }
 0x3a1   :  { %2585 = vmatprep.subr.bf16.mxu0 %v4084_v23  ;;  %2667 = vmatprep.subr.bf16.mxu1 %v4086_v55  ;;  %v994_v23 = vld [vmem:[#allocation10 + $0x10] sm:$0xff] }
 0x3a2   :  { %v998_v55 = vld [vmem:[#allocation10 + $0x30] sm:$0xff] }
 0x3a3   :  { %v3895_v43 = vcombine.low %v994_v23, %v998_v55 }
 0x3a4   :  { %2586 = vmatpush1.bf16.msra.mxu0 %v4083_v61  ;;  %2668 = vmatpush1.bf16.msra.mxu1 %v4085_v62  ;;  %v986_v61 = vmax.f32 %v4958_v36, %v982_v54  ;;  %v3896_v62 = vcombine.high %v994_v23, %v998_v55  ;;  %v1011_v36 = vld [vmem:[#allocation10 + $0x98] sm:$0xff] }
 0x3a5   :  { %2587 = vmatprep.subr.bf16.mxu0 %v4092_v63  ;;  %2669 = vmatprep.subr.bf16.mxu1 %v4094_v38  ;;  %v3898_v63 = vcombine.high %v995_v21, %v999_v58  ;;  %v1002_v38 = vld [vmem:[#allocation10 + $0x50] sm:$0xff]  ;;  %v1051_v54 = vld [vmem:[#allocation10 + $0x1d8] sm:$0xff] }
 0x3a6   :  { %v3903_v51 = vcombine.low %v1002_v38, %v1006_v39  ;;  %v1055_v23 = vld [vmem:[#allocation10 + $0x1f8] sm:$0xff] }
 0x3a8   :  { %2588 = vmatpush1.bf16.msra.mxu0 %v4091_v0  ;;  %2670 = vmatpush1.bf16.msra.mxu1 %v4093_v1  ;;  %v4980_v0 = vpack.c.bf16 %v986_v61, %v986_v61  ;;  %v3897_v1 = vcombine.low %v995_v21, %v999_v58  ;;  %v3945_v21 = vcombine.low %v1043_v28, %v1047_v41  ;;  %v1062_v61 = vld [vmem:[#allocation10 + $0x230] sm:$0xff] }
 0x3a9   :  { %2589 = vmatprep.subr.bf16.mxu0 %v4100_v2  ;;  %2671 = vmatprep.subr.bf16.mxu1 %v4102_v46  ;;  %v3904_v2 = vcombine.high %v1002_v38, %v1006_v39  ;;  %v3906_v46 = vcombine.high %v1003_v40, %v1007_v42  ;;  %v3953_v39 = vcombine.low %v1051_v54, %v1055_v23 }
 0x3ac   :  { %2590 = vmatpush1.bf16.msra.mxu0 %v4099_v52  ;;  %2672 = vmatpush1.bf16.msra.mxu1 %v4101_v3  ;;  %v3905_v52 = vcombine.low %v1003_v40, %v1007_v42  ;;  %v3912_v3 = vcombine.high %v1010_v47, %v1014_v48 }
 0x3ad   :  { %2591 = vmatprep.subr.bf16.mxu0 %v4108_v4  ;;  %2673 = vmatprep.subr.bf16.mxu1 %v4110_v5  ;;  %v3914_v4 = vcombine.high %v1011_v36, %v1015_v50  ;;  %v1018_v5 = vld [vmem:[#allocation10 + $0xd0] sm:$0xff] }
 0x3ae   :  { %v3919_v16 = vcombine.low %v1018_v5, %v1022_v6 }
 0x3b0   :  { %2592 = vmatpush1.bf16.msra.mxu0 %v4107_v10  ;;  %2674 = vmatpush1.bf16.msra.mxu1 %v4109_v11  ;;  %v3913_v10 = vcombine.low %v1011_v36, %v1015_v50  ;;  %v3920_v11 = vcombine.high %v1018_v5, %v1022_v6 }
 0x3b1   :  { %2593 = vmatprep.subr.bf16.mxu0 %v4116_v12  ;;  %2675 = vmatprep.subr.bf16.mxu1 %v4118_v13  ;;  %v3922_v12 = vcombine.high %v1019_v7, %v1023_v8  ;;  %v1026_v13 = vld [vmem:[#allocation10 + $0x110] sm:$0xff] }
 0x3b2   :  { %v3927_v31 = vcombine.low %v1026_v13, %v1030_v14 }
 0x3b4   :  { %2594 = vmatpush1.bf16.msra.mxu0 %v4115_v18  ;;  %2676 = vmatpush1.bf16.msra.mxu1 %v4117_v19  ;;  %v3928_v18 = vcombine.high %v1026_v13, %v1030_v14 }
 0x3b5   :  { %2595 = vmatprep.subr.bf16.mxu0 %v4124_v25  ;;  %2677 = vmatprep.subr.bf16.mxu1 %v4126_v27  ;;  %v1034_v25 = vld [vmem:[#allocation10 + $0x150] sm:$0xff] }
 0x3b6   :  { %v1038_v27 = vld [vmem:[#allocation10 + $0x170] sm:$0xff] }
 0x3b7   :  { %v3935_v44 = vcombine.low %v1034_v25, %v1038_v27 }
 0x3b8   :  { %2596 = vmatpush1.bf16.msra.mxu0 %v4123_v33  ;;  %2678 = vmatpush1.bf16.msra.mxu1 %v4125_v34  ;;  %v3936_v33 = vcombine.high %v1034_v25, %v1038_v27  ;;  %v3938_v34 = vcombine.high %v1035_v29, %v1039_v30 }
 0x3b9   :  { %2597 = vmatprep.subr.bf16.mxu0 %v4132_v35  ;;  %2679 = vmatprep.subr.bf16.mxu1 %v4134_v20  ;;  %v1042_v35 = vld [vmem:[#allocation10 + $0x190] sm:$0xff] }
 0x3ba   :  { %v1046_v20 = vld [vmem:[#allocation10 + $0x1b0] sm:$0xff] }
 0x3bb   :  { %v3943_v55 = vcombine.low %v1042_v35, %v1046_v20 }
 0x3bc   :  { %2598 = vmatpush1.bf16.msra.mxu0 %v4131_v22  ;;  %2680 = vmatpush1.bf16.msra.mxu1 %v4133_v49  ;;  %v3944_v22 = vcombine.high %v1042_v35, %v1046_v20  ;;  %v3946_v49 = vcombine.high %v1043_v28, %v1047_v41 }
 0x3bd   :  { %2599 = vmatprep.subr.bf16.mxu0 %v4140_v53  ;;  %2681 = vmatprep.subr.bf16.mxu1 %v4142_v56  ;;  %v1050_v53 = vld [vmem:[#allocation10 + $0x1d0] sm:$0xff] }
 0x3be   :  { %v1054_v56 = vld [vmem:[#allocation10 + $0x1f0] sm:$0xff] }
 0x3bf   :  { %v3952_v58 = vcombine.high %v1050_v53, %v1054_v56  ;;  %v3951_v38 = vcombine.low %v1050_v53, %v1054_v56 }
 0x3c0   :  { %2600 = vmatpush1.bf16.msra.mxu0 %v4139_v59  ;;  %2682 = vmatpush1.bf16.msra.mxu1 %v4141_v60  ;;  %v3954_v59 = vcombine.high %v1051_v54, %v1055_v23  ;;  %v1058_v60 = vld [vmem:[#allocation10 + $0x210] sm:$0xff] }
 0x3c1   :  { %2692 = vmatprep.subr.bf16.mxu0 %v3896_v62  ;;  %2774 = vmatprep.subr.bf16.mxu1 %v3898_v63  ;;  %v1059_v62 = vld [vmem:[#allocation10 + $0x218] sm:$0xff]  ;;  %v3960_v40 = vcombine.high %v1058_v60, %v1062_v61  ;;  %v3959_v47 = vcombine.low %v1058_v60, %v1062_v61 }
 0x3c2   :  { %v1063_v63 = vld [vmem:[#allocation10 + $0x238] sm:$0xff] }
 0x3c3   :  { %2602 = vmatmul.mubr.bf16.vlgmr.msra.gmra.mrb[8].mxu0 %v4980_v0  ;;  %2684 = vmatmul.mubr.bf16.vlgmr.msra.gmra.mrb[8].mxu1 %v4980_v0  ;;  %v3962_v42 = vcombine.high %v1059_v62, %v1063_v63  ;;  %v3961_v48 = vcombine.low %v1059_v62, %v1063_v63 }
 0x3c4   :  { %2693 = vmatpush1.bf16.msra.mxu0 %v3895_v43  ;;  %2724 = vmatprep.mubr.bf16.mxu0 %v4960_v57  ;;  %v1066_v43 = vld [vmem:[#allocation10 + $0x250] sm:$0xff] }
 0x3c5   :  { %2775 = vmatpush1.bf16.msra.mxu1 %v3897_v1  ;;  %2806 = vmatprep.mubr.bf16.mxu1 %v4960_v57  ;;  %v1027_v57 = vld [vmem:[#allocation10 + $0x118] sm:$0xff]  ;;  %v1070_v1 = vld [vmem:[#allocation10 + $0x270] sm:$0xff] }
 0x3c6   :  { %2694 = vmatprep.subr.bf16.mxu0 %v3904_v2  ;;  %2776 = vmatprep.subr.bf16.mxu1 %v3906_v46  ;;  %v3930_v19 = vcombine.high %v1027_v57, %v1031_v15  ;;  %v3929_v32 = vcombine.low %v1027_v57, %v1031_v15  ;;  %v1067_v2 = vld [vmem:[#allocation10 + $0x258] sm:$0xff]  ;;  %v3968_v36 = vcombine.high %v1066_v43, %v1070_v1 }
 0x3c7   :  { %v1071_v46 = vld [vmem:[#allocation10 + $0x278] sm:$0xff]  ;;  %v3967_v5 = vcombine.low %v1066_v43, %v1070_v1 }
 0x3c8   :  { %2695 = vmatpush1.bf16.msra.mxu0 %v3903_v51  ;;  %v3970_v50 = vcombine.high %v1067_v2, %v1071_v46  ;;  %v1074_v51 = vld [vmem:[#allocation10 + $0x290] sm:$0xff]  ;;  %v3969_v6 = vcombine.low %v1067_v2, %v1071_v46 }
 0x3c9   :  { %2777 = vmatpush1.bf16.msra.mxu1 %v3905_v52  ;;  %2696 = vmatprep.subr.bf16.mxu0 %v3912_v3  ;;  %v1078_v52 = vld [vmem:[#allocation10 + $0x2b0] sm:$0xff]  ;;  %v1075_v3 = vld [vmem:[#allocation10 + $0x298] sm:$0xff] }
 0x3ca   :  { %2778 = vmatprep.subr.bf16.mxu1 %v3914_v4  ;;  %v1079_v4 = vld [vmem:[#allocation10 + $0x2b8] sm:$0xff]  ;;  %v3976_v7 = vcombine.high %v1074_v51, %v1078_v52  ;;  %v3975_v13 = vcombine.low %v1074_v51, %v1078_v52 }
 0x3cb   :  { %v3978_v8 = vcombine.high %v1075_v3, %v1079_v4  ;;  %v3977_v14 = vcombine.low %v1075_v3, %v1079_v4  ;;  %v1135_v51 = vld [vmem:[#allocation10 + $0x478] sm:$0xff]  ;;  %v1138_v4 = vld [vmem:[#allocation10 + $0x490] sm:$0xff] }
 0x3cc   :  { %2697 = vmatpush1.bf16.msra.mxu0 %v3911_v9  ;;  %v1082_v9 = vld [vmem:[#allocation10 + $0x2d0] sm:$0xff] }
 0x3cd   :  { %2779 = vmatpush1.bf16.msra.mxu1 %v3913_v10  ;;  %2698 = vmatprep.subr.bf16.mxu0 %v3920_v11  ;;  %v1086_v10 = vld [vmem:[#allocation10 + $0x2f0] sm:$0xff]  ;;  %v1083_v11 = vld [vmem:[#allocation10 + $0x2d8] sm:$0xff] }
 0x3ce   :  { %2780 = vmatprep.subr.bf16.mxu1 %v3922_v12  ;;  %v1087_v12 = vld [vmem:[#allocation10 + $0x2f8] sm:$0xff]  ;;  %v3984_v57 = vcombine.high %v1082_v9, %v1086_v10  ;;  %v3983_v25 = vcombine.low %v1082_v9, %v1086_v10 }
 0x3cf   :  { %v3986_v15 = vcombine.high %v1083_v11, %v1087_v12  ;;  %v3985_v27 = vcombine.low %v1083_v11, %v1087_v12 }
 0x3d0   :  { %2699 = vmatpush1.bf16.msra.mxu0 %v3919_v16  ;;  %v1090_v16 = vld [vmem:[#allocation10 + $0x310] sm:$0xff] }
 0x3d1   :  { %2781 = vmatpush1.bf16.msra.mxu1 %v3921_v17  ;;  %2700 = vmatprep.subr.bf16.mxu0 %v3928_v18  ;;  %v1094_v17 = vld [vmem:[#allocation10 + $0x330] sm:$0xff]  ;;  %v1091_v18 = vld [vmem:[#allocation10 + $0x318] sm:$0xff] }
 0x3d2   :  { %2782 = vmatprep.subr.bf16.mxu1 %v3930_v19  ;;  %v1095_v19 = vld [vmem:[#allocation10 + $0x338] sm:$0xff]  ;;  %v3992_v29 = vcombine.high %v1090_v16, %v1094_v17  ;;  %v3991_v35 = vcombine.low %v1090_v16, %v1094_v17 }
 0x3d3   :  { %v3994_v30 = vcombine.high %v1091_v18, %v1095_v19  ;;  %v3993_v20 = vcombine.low %v1091_v18, %v1095_v19  ;;  %v1154_v19 = vld [vmem:[#allocation10 + $0x510] sm:$0xff] }
 0x3d4   :  { %2701 = vmatpush1.bf16.msra.mxu0 %v3927_v31  ;;  %v1098_v31 = vld [vmem:[#allocation10 + $0x350] sm:$0xff] }
 0x3d5   :  { %2783 = vmatpush1.bf16.msra.mxu1 %v3929_v32  ;;  %2702 = vmatprep.subr.bf16.mxu0 %v3936_v33  ;;  %v1102_v32 = vld [vmem:[#allocation10 + $0x370] sm:$0xff]  ;;  %v1099_v33 = vld [vmem:[#allocation10 + $0x358] sm:$0xff] }
 0x3d6   :  { %2784 = vmatprep.subr.bf16.mxu1 %v3938_v34  ;;  %v1103_v34 = vld [vmem:[#allocation10 + $0x378] sm:$0xff]  ;;  %v4000_v28 = vcombine.high %v1098_v31, %v1102_v32  ;;  %v3999_v53 = vcombine.low %v1098_v31, %v1102_v32 }
 0x3d7   :  { %v4002_v41 = vcombine.high %v1099_v33, %v1103_v34  ;;  %v4001_v56 = vcombine.low %v1099_v33, %v1103_v34  ;;  %v1162_v33 = vld [vmem:[#allocation10 + $0x550] sm:$0xff] }
 0x3d8   :  { %2703 = vmatpush1.bf16.msra.mxu0 %v3935_v44  ;;  %v1106_v44 = vld [vmem:[#allocation10 + $0x390] sm:$0xff] }
 0x3d9   :  { %2785 = vmatpush1.bf16.msra.mxu1 %v3937_v45  ;;  %2704 = vmatprep.subr.bf16.mxu0 %v3944_v22  ;;  %v1110_v45 = vld [vmem:[#allocation10 + $0x3b0] sm:$0xff]  ;;  %v1107_v22 = vld [vmem:[#allocation10 + $0x398] sm:$0xff] }
 0x3da   :  { %2786 = vmatprep.subr.bf16.mxu1 %v3946_v49  ;;  %v1111_v49 = vld [vmem:[#allocation10 + $0x3b8] sm:$0xff]  ;;  %v4008_v54 = vcombine.high %v1106_v44, %v1110_v45  ;;  %v4007_v60 = vcombine.low %v1106_v44, %v1110_v45  ;;  %v1166_v34 = vld [vmem:[#allocation10 + $0x570] sm:$0xff] }
 0x3db   :  { %v4010_v23 = vcombine.high %v1107_v22, %v1111_v49  ;;  %v4009_v61 = vcombine.low %v1107_v22, %v1111_v49  ;;  %v4064_v44 = vcombine.high %v1162_v33, %v1166_v34  ;;  %v1170_v22 = vld [vmem:[#allocation10 + $0x590] sm:$0xff] }
 0x3dc   :  { %2705 = vmatpush1.bf16.msra.mxu0 %v3943_v55  ;;  %v1114_v55 = vld [vmem:[#allocation10 + $0x3d0] sm:$0xff] }
 0x3dd   :  { %2787 = vmatpush1.bf16.msra.mxu1 %v3945_v21  ;;  %2706 = vmatprep.subr.bf16.mxu0 %v3952_v58  ;;  %v1118_v21 = vld [vmem:[#allocation10 + $0x3f0] sm:$0xff]  ;;  %v1115_v58 = vld [vmem:[#allocation10 + $0x3d8] sm:$0xff] }
 0x3de   :  { %2788 = vmatprep.subr.bf16.mxu1 %v3954_v59  ;;  %v1119_v59 = vld [vmem:[#allocation10 + $0x3f8] sm:$0xff]  ;;  %v4016_v62 = vcombine.high %v1114_v55, %v1118_v21  ;;  %v4015_v43 = vcombine.low %v1114_v55, %v1118_v21  ;;  %v1174_v49 = vld [vmem:[#allocation10 + $0x5b0] sm:$0xff] }
 0x3df   :  { %v4018_v63 = vcombine.high %v1115_v58, %v1119_v59  ;;  %v4017_v1 = vcombine.low %v1115_v58, %v1119_v59  ;;  %v4072_v55 = vcombine.high %v1170_v22, %v1174_v49  ;;  %v1178_v58 = vld [vmem:[#allocation10 + $0x5d0] sm:$0xff] }
 0x3e0   :  { %2707 = vmatpush1.bf16.msra.mxu0 %v3951_v38  ;;  %v1122_v38 = vld [vmem:[#allocation10 + $0x410] sm:$0xff] }
 0x3e1   :  { %2789 = vmatpush1.bf16.msra.mxu1 %v3953_v39  ;;  %2708 = vmatprep.subr.bf16.mxu0 %v3960_v40  ;;  %v1126_v39 = vld [vmem:[#allocation10 + $0x430] sm:$0xff]  ;;  %v1123_v40 = vld [vmem:[#allocation10 + $0x418] sm:$0xff] }
 0x3e2   :  { %2790 = vmatprep.subr.bf16.mxu1 %v3962_v42  ;;  %v1127_v42 = vld [vmem:[#allocation10 + $0x438] sm:$0xff]  ;;  %v4024_v2 = vcombine.high %v1122_v38, %v1126_v39  ;;  %v1182_v59 = vld [vmem:[#allocation10 + $0x5f0] sm:$0xff] }
 0x3e3   :  { %v4026_v46 = vcombine.high %v1123_v40, %v1127_v42  ;;  %v4025_v52 = vcombine.low %v1123_v40, %v1127_v42  ;;  %v1186_v40 = vld [vmem:[#allocation10 + $0x610] sm:$0xff] }
 0x3e4   :  { %2709 = vmatpush1.bf16.msra.mxu0 %v3959_v47  ;;  %v1130_v47 = vld [vmem:[#allocation10 + $0x450] sm:$0xff] }
 0x3e5   :  { %2791 = vmatpush1.bf16.msra.mxu1 %v3961_v48  ;;  %2710 = vmatprep.subr.bf16.mxu0 %v3968_v36  ;;  %v1134_v48 = vld [vmem:[#allocation10 + $0x470] sm:$0xff]  ;;  %v4023_v36 = vcombine.low %v1122_v38, %v1126_v39  ;;  %v4080_v38 = vcombine.high %v1178_v58, %v1182_v59 }
 0x3e6   :  { %2792 = vmatprep.subr.bf16.mxu1 %v3970_v50  ;;  %v1131_v50 = vld [vmem:[#allocation10 + $0x458] sm:$0xff]  ;;  %v4032_v3 = vcombine.high %v1130_v47, %v1134_v48  ;;  %v4031_v9 = vcombine.low %v1130_v47, %v1134_v48  ;;  %v1190_v42 = vld [vmem:[#allocation10 + $0x630] sm:$0xff] }
 0x3e7   :  { %v4033_v10 = vcombine.low %v1131_v50, %v1135_v51  ;;  %v4088_v47 = vcombine.high %v1186_v40, %v1190_v42 }
 0x3e8   :  { %2711 = vmatpush1.bf16.msra.mxu0 %v3967_v5  ;;  %v1142_v5 = vld [vmem:[#allocation10 + $0x4b0] sm:$0xff] }
 0x3e9   :  { %2793 = vmatpush1.bf16.msra.mxu1 %v3969_v6  ;;  %2712 = vmatprep.subr.bf16.mxu0 %v3976_v7  ;;  %v4034_v6 = vcombine.high %v1131_v50, %v1135_v51  ;;  %v1139_v7 = vld [vmem:[#allocation10 + $0x498] sm:$0xff]  ;;  %v4040_v11 = vcombine.high %v1138_v4, %v1142_v5  ;;  %v4039_v16 = vcombine.low %v1138_v4, %v1142_v5  ;;  %v1198_v50 = vld [vmem:[#allocation10 + $0x670] sm:$0xff] }
 0x3ea   :  { %2794 = vmatprep.subr.bf16.mxu1 %v3978_v8  ;;  %v1143_v8 = vld [vmem:[#allocation10 + $0x4b8] sm:$0xff] }
 0x3eb   :  { %v4042_v12 = vcombine.high %v1139_v7, %v1143_v8  ;;  %v1195_v51 = vld [vmem:[#allocation10 + $0x658] sm:$0xff] }
 0x3ec   :  { %2713 = vmatpush1.bf16.msra.mxu0 %v3975_v13  ;;  %v1146_v13 = vld [vmem:[#allocation10 + $0x4d0] sm:$0xff] }
 0x3ed   :  { %2795 = vmatpush1.bf16.msra.mxu1 %v3977_v14  ;;  %2714 = vmatprep.subr.bf16.mxu0 %v3984_v57  ;;  %v1150_v14 = vld [vmem:[#allocation10 + $0x4f0] sm:$0xff]  ;;  %v1147_v57 = vld [vmem:[#allocation10 + $0x4d8] sm:$0xff] }
 0x3ee   :  { %2796 = vmatprep.subr.bf16.mxu1 %v3986_v15  ;;  %v1151_v15 = vld [vmem:[#allocation10 + $0x4f8] sm:$0xff]  ;;  %v4048_v17 = vcombine.high %v1146_v13, %v1150_v14 }
 0x3ef   :  { %v4050_v18 = vcombine.high %v1147_v57, %v1151_v15 }
 0x3f0   :  { %2715 = vmatpush1.bf16.msra.mxu0 %v3983_v25  ;;  %v1158_v25 = vld [vmem:[#allocation10 + $0x530] sm:$0xff] }
 0x3f1   :  { %2797 = vmatpush1.bf16.msra.mxu1 %v3985_v27  ;;  %2716 = vmatprep.subr.bf16.mxu0 %v3992_v29  ;;  %v1155_v27 = vld [vmem:[#allocation10 + $0x518] sm:$0xff]  ;;  %v4056_v31 = vcombine.high %v1154_v19, %v1158_v25 }
 0x3f2   :  { %2798 = vmatprep.subr.bf16.mxu1 %v3994_v30  ;;  %v1159_v29 = vld [vmem:[#allocation10 + $0x538] sm:$0xff]  ;;  %v4049_v30 = vcombine.low %v1147_v57, %v1151_v15  ;;  %v1210_v57 = vld [vmem:[#allocation10 + $0x6d0] sm:$0xff] }
 0x3f3   :  { %v4058_v32 = vcombine.high %v1155_v27, %v1159_v29  ;;  %v1214_v15 = vld [vmem:[#allocation10 + $0x6f0] sm:$0xff] }
 0x3f4   :  { %2717 = vmatpush1.bf16.msra.mxu0 %v3991_v35  ;;  %v1163_v35 = vld [vmem:[#allocation10 + $0x558] sm:$0xff] }
 0x3f5   :  { %2799 = vmatpush1.bf16.msra.mxu1 %v3993_v20  ;;  %2718 = vmatprep.subr.bf16.mxu0 %v4000_v28  ;;  %v1167_v20 = vld [vmem:[#allocation10 + $0x578] sm:$0xff]  ;;  %v4055_v28 = vcombine.low %v1154_v19, %v1158_v25  ;;  %v4112_v19 = vcombine.high %v1210_v57, %v1214_v15 }
 0x3f6   :  { %2800 = vmatprep.subr.bf16.mxu1 %v4002_v41  ;;  %v4057_v41 = vcombine.low %v1155_v27, %v1159_v29  ;;  %v4066_v45 = vcombine.high %v1163_v35, %v1167_v20  ;;  %v1218_v27 = vld [vmem:[#allocation10 + $0x710] sm:$0xff] }
 0x3f7   :  { %v1222_v29 = vld [vmem:[#allocation10 + $0x730] sm:$0xff] }
 0x3f8   :  { %2719 = vmatpush1.bf16.msra.mxu0 %v3999_v53  ;;  %v1171_v53 = vld [vmem:[#allocation10 + $0x598] sm:$0xff] }
 0x3f9   :  { %2801 = vmatpush1.bf16.msra.mxu1 %v4001_v56  ;;  %2720 = vmatprep.subr.bf16.mxu0 %v4008_v54  ;;  %v1175_v56 = vld [vmem:[#allocation10 + $0x5b8] sm:$0xff]  ;;  %v4063_v54 = vcombine.low %v1162_v33, %v1166_v34  ;;  %v4120_v33 = vcombine.high %v1218_v27, %v1222_v29 }
 0x3fa   :  { %2802 = vmatprep.subr.bf16.mxu1 %v4010_v23  ;;  %v4065_v23 = vcombine.low %v1163_v35, %v1167_v20  ;;  %v4074_v21 = vcombine.high %v1171_v53, %v1175_v56  ;;  %v1226_v35 = vld [vmem:[#allocation10 + $0x750] sm:$0xff] }
 0x3fb   :  { %v1230_v20 = vld [vmem:[#allocation10 + $0x770] sm:$0xff] }
 0x3fc   :  { %2721 = vmatpush1.bf16.msra.mxu0 %v4007_v60  ;;  %v1179_v60 = vld [vmem:[#allocation10 + $0x5d8] sm:$0xff] }
 0x3fd   :  { %2803 = vmatpush1.bf16.msra.mxu1 %v4009_v61  ;;  %2722 = vmatprep.subr.bf16.mxu0 %v4016_v62  ;;  %v1183_v61 = vld [vmem:[#allocation10 + $0x5f8] sm:$0xff]  ;;  %v4071_v62 = vcombine.low %v1170_v22, %v1174_v49  ;;  %v4128_v22 = vcombine.high %v1226_v35, %v1230_v20 }
 0x3fe   :  { %2804 = vmatprep.subr.bf16.mxu1 %v4018_v63  ;;  %v4073_v63 = vcombine.low %v1171_v53, %v1175_v56  ;;  %v4082_v39 = vcombine.high %v1179_v60, %v1183_v61  ;;  %v1234_v53 = vld [vmem:[#allocation10 + $0x790] sm:$0xff] }
 0x3ff   :  { %v1238_v56 = vld [vmem:[#allocation10 + $0x7b0] sm:$0xff] }
 0x400   :  { %2723 = vmatpush1.bf16.msra.mxu0 %v4015_v43  ;;  %v1187_v43 = vld [vmem:[#allocation10 + $0x618] sm:$0xff] }
 0x401   :  { %2805 = vmatpush1.bf16.msra.mxu1 %v4017_v1  ;;  %2733 = vmatprep.subr.bf16.mxu0 %v4024_v2  ;;  %v1191_v1 = vld [vmem:[#allocation10 + $0x638] sm:$0xff]  ;;  %v4079_v2 = vcombine.low %v1178_v58, %v1182_v59  ;;  %v4136_v58 = vcombine.high %v1234_v53, %v1238_v56 }
 0x402   :  { %2815 = vmatprep.subr.bf16.mxu1 %v4026_v46  ;;  %v4081_v46 = vcombine.low %v1179_v60, %v1183_v61  ;;  %v4090_v48 = vcombine.high %v1187_v43, %v1191_v1  ;;  %v4089_v4 = vcombine.low %v1187_v43, %v1191_v1  ;;  %v1242_v60 = vld [vmem:[#allocation10 + $0x7d0] sm:$0xff] }
 0x403   :  { %2725 = vmatmul.mubr.bf16.vlgmr.msra.gmra.mrb[12].mxu0 %v4962_v24  ;;  %v1246_v61 = vld [vmem:[#allocation10 + $0x7f0] sm:$0xff] }
 0x404   :  { %2807 = vmatmul.mubr.bf16.vlgmr.msra.gmra.mrb[12].mxu1 %v4962_v24  ;;  %2734 = vmatpush1.bf16.msra.mxu0 %v4023_v36  ;;  %v4041_v24 = vcombine.low %v1139_v7, %v1143_v8  ;;  %v1194_v36 = vld [vmem:[#allocation10 + $0x650] sm:$0xff]  ;;  %v4143_v43 = vcombine.low %v1242_v60, %v1246_v61 }
 0x405   :  { %2765 = vmatprep.mubr.bf16.mxu0 %v4968_v37  ;;  %2816 = vmatpush1.bf16.msra.mxu1 %v4025_v52  ;;  %v1199_v52 = vld [vmem:[#allocation10 + $0x678] sm:$0xff]  ;;  %v4096_v5 = vcombine.high %v1194_v36, %v1198_v50  ;;  %v1202_v7 = vld [vmem:[#allocation10 + $0x690] sm:$0xff] }
 0x406   :  { %2847 = vmatprep.mubr.bf16.mxu1 %v4968_v37  ;;  %2735 = vmatprep.subr.bf16.mxu0 %v4032_v3  ;;  %v4047_v37 = vcombine.low %v1146_v13, %v1150_v14  ;;  %v4087_v3 = vcombine.low %v1186_v40, %v1190_v42  ;;  %v1206_v8 = vld [vmem:[#allocation10 + $0x6b0] sm:$0xff]  ;;  %v4144_v40 = vcombine.high %v1242_v60, %v1246_v61 }
 0x407   :  { %2817 = vmatprep.subr.bf16.mxu1 %v4034_v6  ;;  %v4098_v6 = vcombine.high %v1195_v51, %v1199_v52  ;;  %v4104_v13 = vcombine.high %v1202_v7, %v1206_v8 }
 0x408   :  { %2736 = vmatpush1.bf16.msra.mxu0 %v4031_v9  ;;  %v1203_v9 = vld [vmem:[#allocation10 + $0x698] sm:$0xff] }
 0x409   :  { %2818 = vmatpush1.bf16.msra.mxu1 %v4033_v10  ;;  %2737 = vmatprep.subr.bf16.mxu0 %v4040_v11  ;;  %v1207_v10 = vld [vmem:[#allocation10 + $0x6b8] sm:$0xff]  ;;  %v4095_v11 = vcombine.low %v1194_v36, %v1198_v50  ;;  %v4471_v36 = vld [vmem:[#allocation11 + $0x48] sm:$0xff]  }
 0x40a   :  { %2819 = vmatprep.subr.bf16.mxu1 %v4042_v12  ;;  %v4097_v12 = vcombine.low %v1195_v51, %v1199_v52  ;;  %v4106_v14 = vcombine.high %v1203_v9, %v1207_v10  ;;  %v4472_v50 = vld [vmem:[#allocation11 + $0xc8] sm:$0xff]  }
 0x40b   :  { %v4473_v51 = vld [vmem:[#allocation11 + $0x8] sm:$0xff]  }
 0x40c   :  { %2738 = vmatpush1.bf16.msra.mxu0 %v4039_v16  ;;  %v1211_v16 = vld [vmem:[#allocation10 + $0x6d8] sm:$0xff]  ;;  %v4474_v52 = vld [vmem:[#allocation11 + $0x88] sm:$0xff]  }
 0x40d   :  { %2820 = vmatpush1.bf16.msra.mxu1 %v4041_v24  ;;  %2739 = vmatprep.subr.bf16.mxu0 %v4048_v17  ;;  %v1215_v24 = vld [vmem:[#allocation10 + $0x6f8] sm:$0xff]  ;;  %v4103_v17 = vcombine.low %v1202_v7, %v1206_v8 }
 0x40e   :  { %2821 = vmatprep.subr.bf16.mxu1 %v4050_v18  ;;  %v4105_v18 = vcombine.low %v1203_v9, %v1207_v10  ;;  %v4114_v25 = vcombine.high %v1211_v16, %v1215_v24  ;;  %v4479_v7 = vld [vmem:[#allocation11 + $0x58] sm:$0xff]   ;;  %v4483_v10 = vld [vmem:[#allocation11 + $0x60] sm:$0xff]  }
 0x40f   :  { %v4480_v8 = vld [vmem:[#allocation11 + $0xd8] sm:$0xff]  }
 0x410   :  { %2740 = vmatpush1.bf16.msra.mxu0 %v4047_v37  ;;  %v1219_v37 = vld [vmem:[#allocation10 + $0x718] sm:$0xff] }
 0x411   :  { %2822 = vmatpush1.bf16.msra.mxu1 %v4049_v30  ;;  %2741 = vmatprep.subr.bf16.mxu0 %v4056_v31  ;;  %v1223_v30 = vld [vmem:[#allocation10 + $0x738] sm:$0xff]  ;;  %v4111_v31 = vcombine.low %v1210_v57, %v1214_v15  ;;  %v4488_v57 = vld [vmem:[#allocation11 + $0xe8] sm:$0xff]  }
 0x412   :  { %2823 = vmatprep.subr.bf16.mxu1 %v4058_v32  ;;  %v4113_v32 = vcombine.low %v1211_v16, %v1215_v24  ;;  %v4122_v34 = vcombine.high %v1219_v37, %v1223_v30  ;;  %v4481_v9 = vld [vmem:[#allocation11 + $0x18] sm:$0xff]   ;;  %v4489_v15 = vld [vmem:[#allocation11 + $0x28] sm:$0xff]   ;;  %v4491_v24 = vld [vmem:[#allocation11 + $0x70] sm:$0xff]  }
 0x413   :  { %v4490_v16 = vld [vmem:[#allocation11 + $0xa8] sm:$0xff]  }
 0x414   :  { %2742 = vmatpush1.bf16.msra.mxu0 %v4055_v28  ;;  %v1227_v28 = vld [vmem:[#allocation10 + $0x758] sm:$0xff] }
 0x415   :  { %2824 = vmatpush1.bf16.msra.mxu1 %v4057_v41  ;;  %2743 = vmatprep.subr.bf16.mxu0 %v4064_v44  ;;  %v1231_v41 = vld [vmem:[#allocation10 + $0x778] sm:$0xff]  ;;  %v4119_v44 = vcombine.low %v1218_v27, %v1222_v29 }
 0x416   :  { %2825 = vmatprep.subr.bf16.mxu1 %v4066_v45  ;;  %v4121_v45 = vcombine.low %v1219_v37, %v1223_v30  ;;  %v4130_v49 = vcombine.high %v1227_v28, %v1231_v41  ;;  %v4496_v27 = vld [vmem:[#allocation11 + $0xf8] sm:$0xff]  }
 0x417   :  { %v4497_v29 = vld [vmem:[#allocation11 + $0x38] sm:$0xff]  }
 0x418   :  { %2744 = vmatpush1.bf16.msra.mxu0 %v4063_v54  ;;  %v1235_v54 = vld [vmem:[#allocation10 + $0x798] sm:$0xff] }
 0x419   :  { %2826 = vmatpush1.bf16.msra.mxu1 %v4065_v23  ;;  %2745 = vmatprep.subr.bf16.mxu0 %v4072_v55  ;;  %v1239_v23 = vld [vmem:[#allocation10 + $0x7b8] sm:$0xff]  ;;  %v4127_v55 = vcombine.low %v1226_v35, %v1230_v20 }
 0x41a   :  { %2827 = vmatprep.subr.bf16.mxu1 %v4074_v21  ;;  %v4129_v21 = vcombine.low %v1227_v28, %v1231_v41  ;;  %v4138_v59 = vcombine.high %v1235_v54, %v1239_v23  ;;  %v4498_v37 = vld [vmem:[#allocation11 + $0xb8] sm:$0xff]  }
 0x41c   :  { %2746 = vmatpush1.bf16.msra.mxu0 %v4071_v62  ;;  %v1243_v62 = vld [vmem:[#allocation10 + $0x7d8] sm:$0xff] }
 0x41d   :  { %2828 = vmatpush1.bf16.msra.mxu1 %v4073_v63  ;;  %2747 = vmatprep.subr.bf16.mxu0 %v4080_v38  ;;  %v1247_v63 = vld [vmem:[#allocation10 + $0x7f8] sm:$0xff]  ;;  %v4135_v38 = vcombine.low %v1234_v53, %v1238_v56 }
 0x41e   :  { %2829 = vmatprep.subr.bf16.mxu1 %v4082_v39  ;;  %v4137_v39 = vcombine.low %v1235_v54, %v1239_v23  ;;  %v4146_v42 = vcombine.high %v1243_v62, %v1247_v63  ;;  %v4145_v1 = vcombine.low %v1243_v62, %v1247_v63 }
 0x420   :  { %2748 = vmatpush1.bf16.msra.mxu0 %v4079_v2  ;;  %v4467_v2 = vld [vmem:[#allocation11 + $0x40] sm:$0xff]  }
 0x421   :  { %2830 = vmatpush1.bf16.msra.mxu1 %v4081_v46  ;;  %2749 = vmatprep.subr.bf16.mxu0 %v4088_v47  ;;  %v4468_v46 = vld [vmem:[#allocation11 + $0xc0] sm:$0xff]  }
 0x422   :  { %2831 = vmatprep.subr.bf16.mxu1 %v4090_v48  ;;  %v4469_v47 = vld [vmem:[#allocation11] sm:$0xff]  }
 0x423   :  { %v4470_v48 = vld [vmem:[#allocation11 + $0x80] sm:$0xff]  }
 0x424   :  { %2750 = vmatpush1.bf16.msra.mxu0 %v4087_v3  ;;  %v4475_v3 = vld [vmem:[#allocation11 + $0x50] sm:$0xff]  }
 0x425   :  { %2832 = vmatpush1.bf16.msra.mxu1 %v4089_v4  ;;  %2751 = vmatprep.subr.bf16.mxu0 %v4096_v5  ;;  %v4476_v4 = vld [vmem:[#allocation11 + $0xd0] sm:$0xff]  }
 0x426   :  { %2833 = vmatprep.subr.bf16.mxu1 %v4098_v6  ;;  %v4477_v5 = vld [vmem:[#allocation11 + $0x10] sm:$0xff]  }
 0x427   :  { %v4478_v6 = vld [vmem:[#allocation11 + $0x90] sm:$0xff]  }
 0x428   :  { %2752 = vmatpush1.bf16.msra.mxu0 %v4095_v11  ;;  %v4484_v11 = vld [vmem:[#allocation11 + $0xe0] sm:$0xff]  }
 0x429   :  { %2834 = vmatpush1.bf16.msra.mxu1 %v4097_v12  ;;  %2753 = vmatprep.subr.bf16.mxu0 %v4104_v13  ;;  %v4485_v12 = vld [vmem:[#allocation11 + $0x20] sm:$0xff]  }
 0x42a   :  { %2835 = vmatprep.subr.bf16.mxu1 %v4106_v14  ;;  %v4486_v13 = vld [vmem:[#allocation11 + $0xa0] sm:$0xff]   ;;  %v4487_v14 = vld [vmem:[#allocation11 + $0x68] sm:$0xff]  }
 0x42c   :  { %2754 = vmatpush1.bf16.msra.mxu0 %v4103_v17  ;;  %v4492_v17 = vld [vmem:[#allocation11 + $0xf0] sm:$0xff]  }
 0x42d   :  { %2836 = vmatpush1.bf16.msra.mxu1 %v4105_v18  ;;  %2755 = vmatprep.subr.bf16.mxu0 %v4112_v19  ;;  %v4493_v18 = vld [vmem:[#allocation11 + $0x30] sm:$0xff]  }
 0x42e   :  { %2837 = vmatprep.subr.bf16.mxu1 %v4114_v25  ;;  %v4494_v19 = vld [vmem:[#allocation11 + $0xb0] sm:$0xff]   ;;  %v4495_v25 = vld [vmem:[#allocation11 + $0x78] sm:$0xff]  }
 0x430   :  { %2756 = vmatpush1.bf16.msra.mxu0 %v4111_v31 }
 0x431   :  { %2838 = vmatpush1.bf16.msra.mxu1 %v4113_v32  ;;  %2757 = vmatprep.subr.bf16.mxu0 %v4120_v33 }
 0x432   :  { %2839 = vmatprep.subr.bf16.mxu1 %v4122_v34 }
 0x434   :  { %2758 = vmatpush1.bf16.msra.mxu0 %v4119_v44 }
 0x435   :  { %2840 = vmatpush1.bf16.msra.mxu1 %v4121_v45  ;;  %2759 = vmatprep.subr.bf16.mxu0 %v4128_v22 }
 0x436   :  { %2841 = vmatprep.subr.bf16.mxu1 %v4130_v49 }
 0x438   :  { %2760 = vmatpush1.bf16.msra.mxu0 %v4127_v55 }
 0x439   :  { %2842 = vmatpush1.bf16.msra.mxu1 %v4129_v21  ;;  %2761 = vmatprep.subr.bf16.mxu0 %v4136_v58 }
 0x43a   :  { %2843 = vmatprep.subr.bf16.mxu1 %v4138_v59 }
 0x43c   :  { %2762 = vmatpush1.bf16.msra.mxu0 %v4135_v38 }
 0x43d   :  { %2844 = vmatpush1.bf16.msra.mxu1 %v4137_v39  ;;  %2763 = vmatprep.subr.bf16.mxu0 %v4144_v40 }
 0x43e   :  { %2845 = vmatprep.subr.bf16.mxu1 %v4146_v42 }
 0x440   :  { %2764 = vmatpush1.bf16.msra.mxu0 %v4143_v43 }
 0x441   :  { %2846 = vmatpush1.bf16.msra.mxu1 %v4145_v1  ;;  %4214 = vmatprep.subr.bf16.mxu0 %v4467_v2 }
 0x442   :  { %4236 = vmatprep.subr.bf16.mxu1 %v4468_v46 }
 0x443   :  { %2766 = vmatmul.mubr.bf16.vlgmr.msra.gmra.mrb[12].mxu0 %v4980_v0 }
 0x444   :  { %2848 = vmatmul.mubr.bf16.vlgmr.msra.gmra.mrb[12].mxu1 %v4980_v0  ;;  %4215 = vmatpush3.bf16.msra.mxu0 %v4469_v47  ;;  %v4482_v0 = vld [vmem:[#allocation11 + $0x98] sm:$0xff]  }
 0x445   :  { %4237 = vmatpush3.bf16.msra.mxu1 %v4470_v48  ;;  %4216 = vmatprep.subr.bf16.mxu0 %v4471_v36 }
 0x446   :  { %4238 = vmatprep.subr.bf16.mxu1 %v4472_v50 }
 0x448   :  { %4217 = vmatpush3.bf16.msra.mxu0 %v4473_v51 }
 0x449   :  { %4239 = vmatpush3.bf16.msra.mxu1 %v4474_v52  ;;  %4218 = vmatprep.subr.bf16.mxu0 %v4475_v3 }
 0x44a   :  { %4240 = vmatprep.subr.bf16.mxu1 %v4476_v4 }
 0x44c   :  { %4219 = vmatpush3.bf16.msra.mxu0 %v4477_v5 }
 0x44d   :  { %4241 = vmatpush3.bf16.msra.mxu1 %v4478_v6  ;;  %4220 = vmatprep.subr.bf16.mxu0 %v4479_v7 }
 0x44e   :  { %4242 = vmatprep.subr.bf16.mxu1 %v4480_v8 }
 0x450   :  { %4221 = vmatpush3.bf16.msra.mxu0 %v4481_v9 }
 0x451   :  { %4243 = vmatpush3.bf16.msra.mxu1 %v4482_v0  ;;  %4222 = vmatprep.subr.bf16.mxu0 %v4483_v10 }
 0x452   :  { %4244 = vmatprep.subr.bf16.mxu1 %v4484_v11 }
 0x454   :  { %4223 = vmatpush3.bf16.msra.mxu0 %v4485_v12 }
 0x455   :  { %4245 = vmatpush3.bf16.msra.mxu1 %v4486_v13  ;;  %4224 = vmatprep.subr.bf16.mxu0 %v4487_v14 }
 0x456   :  { %4246 = vmatprep.subr.bf16.mxu1 %v4488_v57 }
 0x458   :  { %4225 = vmatpush3.bf16.msra.mxu0 %v4489_v15 }
 0x459   :  { %4247 = vmatpush3.bf16.msra.mxu1 %v4490_v16  ;;  %4226 = vmatprep.subr.bf16.mxu0 %v4491_v24 }
 0x45a   :  { %4248 = vmatprep.subr.bf16.mxu1 %v4492_v17 }
 0x45c   :  { %4227 = vmatpush3.bf16.msra.mxu0 %v4493_v18 }
 0x45d   :  { %4249 = vmatpush3.bf16.msra.mxu1 %v4494_v19  ;;  %4228 = vmatprep.subr.bf16.mxu0 %v4495_v25 }
 0x45e   :  { %4250 = vmatprep.subr.bf16.mxu1 %v4496_v27 }
 0x460   :  { %4229 = vmatpush3.bf16.msra.mxu0 %v4497_v29 }
 0x461   :  { %4251 = vmatpush3.bf16.msra.mxu1 %v4498_v37 }
 0x496   :  { %v2603_v30 = vpop.f32.mrb[8].mxu0  ;;  %v2685_v31 = vpop.f32.mrb[8].mxu1 }
 0x497   :  { %v2856_v32 = vrot.slane %v2603_v30, 4  ;;  %v2868_v33 = vrot.slane %v2685_v31, 4  ;;  %v2605_v34 = vpop.f32.mrb[9].mxu0  ;;  %v2687_v35 = vpop.f32.mrb[9].mxu1 }
 0x498   :  { %v2862_v20 = vrot.slane %v2605_v34, 4  ;;  %v2874_v28 = vrot.slane %v2687_v35, 4  ;;  %v2607_v41 = vpop.f32.mrb[10].mxu0  ;;  %v2689_v44 = vpop.f32.mrb[10].mxu1 }
 0x499   :  { %v2857_v45 = vadd.f32 %v2856_v32, %v2603_v30  ;;  %v2869_v22 = vadd.f32 %v2868_v33, %v2685_v31  ;;  %v2608_v49 = vpop.f32.mrb[11].mxu0  ;;  %v2690_v53 = vpop.f32.mrb[11].mxu1  ;;  %v4500_v32 = vld [vmem:[#allocation11 + $0x1c0] sm:$0xff]  }
 0x49a   :  { %v2863_v56 = vadd.f32 %v2862_v20, %v2605_v34  ;;  %v2875_v54 = vadd.f32 %v2874_v28, %v2687_v35  ;;  %4280 = vmatprep.subr.bf16.mxu1 %v4500_v32  ;;  %v4509_v32 = vld [vmem:[#allocation11 + $0x110] sm:$0xff]  }
 0x49b   :  { %v2858_v23 = vrot.slane %v2857_v45, 2  ;;  %v2870_v55 = vrot.slane %v2869_v22, 2 }
 0x49c   :  { %v2864_v21 = vrot.slane %v2863_v56, 2  ;;  %v2876_v58 = vrot.slane %v2875_v54, 2 }
 0x49d   :  { %v2859_v59 = vadd.f32 %v2858_v23, %v2857_v45  ;;  %v2871_v60 = vadd.f32 %v2870_v55, %v2869_v22  ;;  %v5004_v23 = vsub.s32 6, %v4900_v26  ;;  %v5006_v55 = vld [vmem:[#allocation13] sm:$0xff] }
 0x49e   :  { %v2865_v61 = vadd.f32 %v2864_v21, %v2863_v56  ;;  %v2877_v62 = vadd.f32 %v2876_v58, %v2875_v54  ;;  %v5001_v54 = vsub.s32 5, %v4900_v26 }
 0x49f   :  { %v2860_v63 = vrot.slane %v2859_v59, 1  ;;  %v2872_v38 = vrot.slane %v2871_v60, 1 }
 0x4a0   :  { %v2866_v39 = vrot.slane %v2865_v61, 1  ;;  %v2878_v40 = vrot.slane %v2877_v62, 1  ;;  %v3011_v21 = vrot.slane %v5006_v55, %v5001_v54 }
 0x4a1   :  { %v2861_v42 = vadd.f32 %v2860_v63, %v2859_v59  ;;  %v2873_v43 = vadd.f32 %v2872_v38, %v2871_v60  ;;  %v4562_v59 = vld [vmem:[#allocation13 + $0x10] sm:$0xff]  ;;  %v3051_v63 = vrot.slane %v5006_v55, %v5004_v23  ;;  %v4563_v38 = vld [vmem:[#allocation13 + $0x8] sm:$0xff] }
 0x4a2   :  { %v2867_v1 = vadd.f32 %v2866_v39, %v2865_v61  ;;  %v2879_v2 = vadd.f32 %v2878_v40, %v2877_v62  ;;  %v3019_v60 = vrot.slane %v4562_v59, %v5001_v54  ;;  %v3015_v39 = vrot.slane %v4563_v38, %v5001_v54 }
 0x4a3   :  { %v2904_v46 = vmul.f32 0.125, %v2861_v42  ;;  %v2906_v47 = vmul.f32 0.125, %v2873_v43  ;;  %v3059_v43 = vrot.slane %v4562_v59, %v5004_v23  ;;  %v4524_v59 = vld [vmem:[#allocation11 + $0x1f0] sm:$0xff]  }
 0x4a4   :  { %v2905_v48 = vmul.f32 0.125, %v2867_v1  ;;  %v2907_v36 = vmul.f32 0.125, %v2879_v2  ;;  %v4564_v1 = vld [vmem:[#allocation13 + $0x18] sm:$0xff] }
 0x4a5   :  { %v2912_v50 = vsub.f32 %v2603_v30, %v2904_v46  ;;  %v2914_v51 = vsub.f32 %v2685_v31, %v2906_v47  ;;  %v4499_v31 = vld [vmem:[#allocation11 + $0x140] sm:$0xff]   ;;  %v3023_v2 = vrot.slane %v4564_v1, %v5001_v54 }
 0x4a6   :  { %v4992_v52 = vsub.f32 %v2605_v34, %v2905_v48  ;;  %v4994_v3 = vsub.f32 %v2687_v35, %v2907_v36  ;;  %4258 = vmatprep.subr.bf16.mxu0 %v4499_v31  ;;  %v3055_v36 = vrot.slane %v4563_v38, %v5004_v23  ;;  %v4508_v31 = vld [vmem:[#allocation11 + $0x1d0] sm:$0xff]   ;;  %v4529_v38 = vld [vmem:[#allocation11 + $0x138] sm:$0xff]  }
 0x4a7   :  { %v2920_v4 = vmul.f32 %v2912_v50, %v2912_v50  ;;  %v2922_v5 = vmul.f32 %v2914_v51, %v2914_v51 }
 0x4a8   :  { %v2921_v6 = vmul.f32 %v4992_v52, %v4992_v52  ;;  %v2923_v7 = vmul.f32 %v4994_v3, %v4994_v3 }
 0x4a9   :  { %v2928_v8 = vrot.slane %v2920_v4, 4  ;;  %v2940_v9 = vrot.slane %v2922_v5, 4 }
 0x4aa   :  { %v2934_v0 = vrot.slane %v2921_v6, 4  ;;  %v2946_v10 = vrot.slane %v2923_v7, 4 }
 0x4ab   :  { %v2929_v11 = vadd.f32 %v2928_v8, %v2920_v4  ;;  %v2941_v12 = vadd.f32 %v2940_v9, %v2922_v5  ;;  %v3063_v5 = vrot.slane %v4564_v1, %v5004_v23 }
 0x4ac   :  { %v2935_v13 = vadd.f32 %v2934_v0, %v2921_v6  ;;  %v2947_v14 = vadd.f32 %v2946_v10, %v2923_v7 }
 0x4ad   :  { %v2930_v57 = vrot.slane %v2929_v11, 2  ;;  %v2942_v15 = vrot.slane %v2941_v12, 2 }
 0x4ae   :  { %v2936_v16 = vrot.slane %v2935_v13, 2  ;;  %v2948_v24 = vrot.slane %v2947_v14, 2 }
 0x4af   :  { %v2931_v17 = vadd.f32 %v2930_v57, %v2929_v11  ;;  %v2943_v18 = vadd.f32 %v2942_v15, %v2941_v12 }
 0x4b0   :  { %v2937_v19 = vadd.f32 %v2936_v16, %v2935_v13  ;;  %v2949_v25 = vadd.f32 %v2948_v24, %v2947_v14  ;;  %v4501_v24 = vld [vmem:[#allocation11 + $0x100] sm:$0xff]  }
 0x4b1   :  { %v2932_v27 = vrot.slane %v2931_v17, 1  ;;  %v2944_v29 = vrot.slane %v2943_v18, 1 }
 0x4b2   :  { %v2938_v37 = vrot.slane %v2937_v19, 1  ;;  %v2950_v30 = vrot.slane %v2949_v25, 1 }
 0x4b3   :  { %v2933_v33 = vadd.f32 %v2932_v27, %v2931_v17  ;;  %v2945_v34 = vadd.f32 %v2944_v29, %v2943_v18  ;;  %v4502_v18 = vld [vmem:[#allocation11 + $0x180] sm:$0xff]   ;;  %v4504_v27 = vld [vmem:[#allocation11 + $0x1c8] sm:$0xff]  }
 0x4b4   :  { %v2939_v35 = vadd.f32 %v2938_v37, %v2937_v19  ;;  %v2951_v20 = vadd.f32 %v2950_v30, %v2949_v25  ;;  %v4503_v19 = vld [vmem:[#allocation11 + $0x148] sm:$0xff]   ;;  %v4507_v30 = vld [vmem:[#allocation11 + $0x150] sm:$0xff]  }
 0x4b5   :  { %v2976_v28 = vmul.f32 0.125, %v2933_v33  ;;  %v2978_v41 = vmul.f32 0.125, %v2945_v34  ;;  %v4505_v29 = vld [vmem:[#allocation11 + $0x108] sm:$0xff]   ;;  %v4510_v33 = vld [vmem:[#allocation11 + $0x190] sm:$0xff]   ;;  %v4511_v34 = vld [vmem:[#allocation11 + $0x158] sm:$0xff]  }
 0x4b6   :  { %v2977_v44 = vmul.f32 0.125, %v2939_v35  ;;  %v2979_v45 = vmul.f32 0.125, %v2951_v20  ;;  %v4506_v37 = vld [vmem:[#allocation11 + $0x188] sm:$0xff]   ;;  %v4512_v35 = vld [vmem:[#allocation11 + $0x1d8] sm:$0xff]  }
 0x4b7   :  { %v2984_v22 = vadd.f32 0.8, %v2976_v28  ;;  %v2986_v49 = vadd.f32 0.8, %v2978_v41  ;;  %v4513_v20 = vld [vmem:[#allocation11 + $0x118] sm:$0xff]   ;;  %v4515_v41 = vld [vmem:[#allocation11 + $0x160] sm:$0xff]  }
 0x4b8   :  { %v2985_v53 = vadd.f32 0.8, %v2977_v44  ;;  %v2987_v56 = vadd.f32 0.8, %v2979_v45  ;;  %v4514_v28 = vld [vmem:[#allocation11 + $0x198] sm:$0xff]   ;;  %v4516_v44 = vld [vmem:[#allocation11 + $0x1e0] sm:$0xff]  }
 0x4b9   :  { %4543 = vrsqrt.f32 %v2984_v22  ;;  %v4517_v45 = vld [vmem:[#allocation11 + $0x120] sm:$0xff]  }
 0x4ba   :  { %4545 = vrsqrt.f32 %v2986_v49  ;;  %v4518_v22 = vld [vmem:[#allocation11 + $0x1a0] sm:$0xff]   ;;  %v4519_v49 = vld [vmem:[#allocation11 + $0x168] sm:$0xff]  }
 0x4bb   :  { %4547 = vrsqrt.f32 %v2985_v53  ;;  %v4520_v53 = vld [vmem:[#allocation11 + $0x1e8] sm:$0xff]  }
 0x4bc   :  { %4549 = vrsqrt.f32 %v2987_v56  ;;  %v4521_v56 = vld [vmem:[#allocation11 + $0x128] sm:$0xff]  }
 0x4c3   :  { %v4544_v58 = vpop.eup %4543 }
 0x4c4   :  { %v4546_v61 = vpop.eup %4545  ;;  %v3000_v62 = vmul.f32 %v4544_v58, %v2912_v50  ;;  %v4523_v58 = vld [vmem:[#allocation11 + $0x170] sm:$0xff]  }
 0x4c5   :  { %v4548_v40 = vpop.eup %4547  ;;  %v3002_v42 = vmul.f32 %v4546_v61, %v2914_v51  ;;  %v4526_v61 = vld [vmem:[#allocation11 + $0x1b0] sm:$0xff]  }
 0x4c6   :  { %v4550_v46 = vpop.eup %4549  ;;  %v3040_v47 = vmul.f32 %v3011_v21, %v3000_v62  ;;  %v3001_v48 = vmul.f32 %v4548_v40, %v4992_v52  ;;  %v4522_v21 = vld [vmem:[#allocation11 + $0x1a8] sm:$0xff]   ;;  %v4527_v62 = vld [vmem:[#allocation11 + $0x178] sm:$0xff]  }
 0x4c7   :  { %v3042_v50 = vmul.f32 %v3019_v60, %v3002_v42  ;;  %v3003_v4 = vmul.f32 %v4550_v46, %v4994_v3  ;;  %v4525_v60 = vld [vmem:[#allocation11 + $0x130] sm:$0xff]  }
 0x4c8   :  { %v3080_v6 = vadd.f32 %v3051_v63, %v3040_v47  ;;  %v3041_v7 = vmul.f32 %v3015_v39, %v3001_v48  ;;  %v4528_v63 = vld [vmem:[#allocation11 + $0x1f8] sm:$0xff]  }
 0x4c9   :  { %v3082_v8 = vadd.f32 %v3059_v43, %v3042_v50  ;;  %v3043_v51 = vmul.f32 %v3023_v2, %v3003_v4  ;;  %v4530_v39 = vld [vmem:[#allocation11 + $0x1b8] sm:$0xff]  }
 0x4ca   :  { %v3081_v9 = vadd.f32 %v3055_v36, %v3041_v7  ;;  %v3088_v0 = vmul.f32 0.2, %v3080_v6 }
 0x4cb   :  { %v3083_v10 = vadd.f32 %v3063_v5, %v3043_v51  ;;  %v3090_v11 = vmul.f32 0.2, %v3082_v8 }
 0x4cc   :  { %v3089_v12 = vmul.f32 0.2, %v3081_v9  ;;  %v3096_v14 = vmax.f32 %v3080_v6, %v3088_v0 }
 0x4cd   :  { %v3091_v13 = vmul.f32 0.2, %v3083_v10  ;;  %v3098_v52 = vmax.f32 %v3082_v8, %v3090_v11 }
 0x4ce   :  { %v3097_v57 = vmax.f32 %v3081_v9, %v3089_v12  ;;  %v3104_v3 = vpack.c.bf16 %v3096_v14, %v3096_v14 }
 0x4cf   :  { %v3099_v15 = vmax.f32 %v3083_v10, %v3091_v13  ;;  %v3106_v25 = vpack.c.bf16 %v3098_v52, %v3098_v52 }
 0x4d0   :  { %v3105_v16 = vpack.c.bf16 %v3097_v57, %v3097_v57 }
 0x4d1   :  { %v3107_v17 = vpack.c.bf16 %v3099_v15, %v3099_v15 }
 0x4d2   :  { %3660 = vmatprep.mubr.bf16.mxu0 %v3105_v16 }
 0x4d3   :  { %3700 = vmatprep.mubr.bf16.mxu1 %v3107_v17  ;;  %3661 = vmatmul.mubr.bf16.vlgmr.msra.gmra.mrb[16].mxu0 %v3104_v3 }
 0x4d4   :  { %3701 = vmatmul.mubr.bf16.vlgmr.msra.gmra.mrb[16].mxu1 %v3106_v25  ;;  %4259 = vmatpush3.bf16.msra.mxu0 %v4501_v24 }
 0x4d5   :  { %4281 = vmatpush3.bf16.msra.mxu1 %v4502_v18  ;;  %4260 = vmatprep.subr.bf16.mxu0 %v4503_v19 }
 0x4d6   :  { %4282 = vmatprep.subr.bf16.mxu1 %v4504_v27 }
 0x4d8   :  { %4261 = vmatpush3.bf16.msra.mxu0 %v4505_v29 }
 0x4d9   :  { %4283 = vmatpush3.bf16.msra.mxu1 %v4506_v37  ;;  %4262 = vmatprep.subr.bf16.mxu0 %v4507_v30 }
 0x4da   :  { %4284 = vmatprep.subr.bf16.mxu1 %v4508_v31 }
 0x4dc   :  { %4263 = vmatpush3.bf16.msra.mxu0 %v4509_v32 }
 0x4dd   :  { %4285 = vmatpush3.bf16.msra.mxu1 %v4510_v33  ;;  %4264 = vmatprep.subr.bf16.mxu0 %v4511_v34 }
 0x4de   :  { %4286 = vmatprep.subr.bf16.mxu1 %v4512_v35 }
 0x4e0   :  { %4265 = vmatpush3.bf16.msra.mxu0 %v4513_v20 }
 0x4e1   :  { %4287 = vmatpush3.bf16.msra.mxu1 %v4514_v28  ;;  %4266 = vmatprep.subr.bf16.mxu0 %v4515_v41 }
 0x4e2   :  { %4288 = vmatprep.subr.bf16.mxu1 %v4516_v44 }
 0x4e4   :  { %4267 = vmatpush3.bf16.msra.mxu0 %v4517_v45 }
 0x4e5   :  { %4289 = vmatpush3.bf16.msra.mxu1 %v4518_v22  ;;  %4268 = vmatprep.subr.bf16.mxu0 %v4519_v49 }
 0x4e6   :  { %4290 = vmatprep.subr.bf16.mxu1 %v4520_v53 }
 0x4e8   :  { %4269 = vmatpush3.bf16.msra.mxu0 %v4521_v56 }
 0x4e9   :  { %4291 = vmatpush3.bf16.msra.mxu1 %v4522_v21  ;;  %4270 = vmatprep.subr.bf16.mxu0 %v4523_v58 }
 0x4ea   :  { %4292 = vmatprep.subr.bf16.mxu1 %v4524_v59 }
 0x4ec   :  { %4271 = vmatpush3.bf16.msra.mxu0 %v4525_v60 }
 0x4ed   :  { %4293 = vmatpush3.bf16.msra.mxu1 %v4526_v61  ;;  %4272 = vmatprep.subr.bf16.mxu0 %v4527_v62 }
 0x4ee   :  { %4294 = vmatprep.subr.bf16.mxu1 %v4528_v63 }
 0x4f0   :  { %4273 = vmatpush3.bf16.msra.mxu0 %v4529_v38 }
 0x4f1   :  { %4295 = vmatpush3.bf16.msra.mxu1 %v4530_v39 }
 0x516   :  { %v2767_v40 = vpop.f32.mrb[12].mxu0 }
 0x517   :  { %v2880_v42 = vrot.slane %v2767_v40, 4  ;;  %v2849_v43 = vpop.f32.mrb[12].mxu1  ;;  %v2769_v1 = vpop.f32.mrb[13].mxu0 }
 0x518   :  { %v2892_v2 = vrot.slane %v2849_v43, 4  ;;  %v2886_v46 = vrot.slane %v2769_v1, 4  ;;  %v2851_v47 = vpop.f32.mrb[13].mxu1  ;;  %v2771_v48 = vpop.f32.mrb[14].mxu0 }
 0x519   :  { %v2881_v36 = vadd.f32 %v2880_v42, %v2767_v40  ;;  %v2898_v50 = vrot.slane %v2851_v47, 4  ;;  %v2853_v4 = vpop.f32.mrb[14].mxu1  ;;  %v2772_v5 = vpop.f32.mrb[15].mxu0 }
 0x51a   :  { %v2893_v6 = vadd.f32 %v2892_v2, %v2849_v43  ;;  %v2887_v7 = vadd.f32 %v2886_v46, %v2769_v1  ;;  %v2854_v8 = vpop.f32.mrb[15].mxu1 }
 0x51b   :  { %v2882_v51 = vrot.slane %v2881_v36, 2  ;;  %v2899_v9 = vadd.f32 %v2898_v50, %v2851_v47 }
 0x51c   :  { %v2894_v0 = vrot.slane %v2893_v6, 2  ;;  %v2888_v10 = vrot.slane %v2887_v7, 2 }
 0x51d   :  { %v2883_v11 = vadd.f32 %v2882_v51, %v2881_v36  ;;  %v2900_v12 = vrot.slane %v2899_v9, 2 }
 0x51e   :  { %v2895_v13 = vadd.f32 %v2894_v0, %v2893_v6  ;;  %v2889_v14 = vadd.f32 %v2888_v10, %v2887_v7  ;;  %v125_v0 = vld [vmem:[#allocation13 + $0x30] sm:$0xff]  ;;  %v124_v10 = vld [vmem:[#allocation13 + $0x28] sm:$0xff] }
 0x51f   :  { %v2884_v57 = vrot.slane %v2883_v11, 1  ;;  %v2901_v52 = vadd.f32 %v2900_v12, %v2899_v9  ;;  %v123_v9 = vld [vmem:[#allocation13 + $0x20] sm:$0xff]  ;;  %v126_v12 = vld [vmem:[#allocation13 + $0x38] sm:$0xff] }
 0x520   :  { %v2896_v15 = vrot.slane %v2895_v13, 1  ;;  %v2890_v16 = vrot.slane %v2889_v14, 1 }
 0x521   :  { %v2885_v24 = vadd.f32 %v2884_v57, %v2883_v11  ;;  %v2902_v17 = vrot.slane %v2901_v52, 1  ;;  %v3027_v11 = vrot.slane %v123_v9, %v5001_v54 }
 0x522   :  { %v2897_v3 = vadd.f32 %v2896_v15, %v2895_v13  ;;  %v2891_v18 = vadd.f32 %v2890_v16, %v2889_v14  ;;  %v3035_v14 = vrot.slane %v125_v0, %v5001_v54  ;;  %v3067_v15 = vrot.slane %v123_v9, %v5004_v23 }
 0x523   :  { %v2908_v19 = vmul.f32 0.125, %v2885_v24  ;;  %v2903_v25 = vadd.f32 %v2902_v17, %v2901_v52  ;;  %v3031_v16 = vrot.slane %v124_v10, %v5001_v54 }
 0x524   :  { %v2910_v27 = vmul.f32 0.125, %v2897_v3  ;;  %v2909_v29 = vmul.f32 0.125, %v2891_v18  ;;  %v3075_v3 = vrot.slane %v125_v0, %v5004_v23  ;;  %v3039_v18 = vrot.slane %v126_v12, %v5001_v54 }
 0x525   :  { %v2916_v37 = vsub.f32 %v2767_v40, %v2908_v19  ;;  %v2911_v30 = vmul.f32 0.125, %v2903_v25 }
 0x526   :  { %v2918_v31 = vsub.f32 %v2849_v43, %v2910_v27  ;;  %v2917_v32 = vsub.f32 %v2769_v1, %v2909_v29  ;;  %v3071_v29 = vrot.slane %v124_v10, %v5004_v23 }
 0x527   :  { %v2924_v33 = vmul.f32 %v2916_v37, %v2916_v37  ;;  %v2919_v34 = vsub.f32 %v2851_v47, %v2911_v30 }
 0x528   :  { %v2926_v35 = vmul.f32 %v2918_v31, %v2918_v31  ;;  %v2925_v20 = vmul.f32 %v2917_v32, %v2917_v32 }
 0x529   :  { %v2952_v28 = vrot.slane %v2924_v33, 4  ;;  %v2927_v41 = vmul.f32 %v2919_v34, %v2919_v34 }
 0x52a   :  { %v2964_v44 = vrot.slane %v2926_v35, 4  ;;  %v2958_v45 = vrot.slane %v2925_v20, 4 }
 0x52b   :  { %v2953_v22 = vadd.f32 %v2952_v28, %v2924_v33  ;;  %v2970_v49 = vrot.slane %v2927_v41, 4 }
 0x52c   :  { %v2965_v53 = vadd.f32 %v2964_v44, %v2926_v35  ;;  %v2959_v56 = vadd.f32 %v2958_v45, %v2925_v20  ;;  %v3079_v35 = vrot.slane %v126_v12, %v5004_v23  ;;  %v3242_v23 = vsub.s32 7, %v4900_v26 }
 0x52d   :  { %v2954_v21 = vrot.slane %v2953_v22, 2  ;;  %v2971_v58 = vadd.f32 %v2970_v49, %v2927_v41 }
 0x52e   :  { %v2966_v59 = vrot.slane %v2965_v53, 2  ;;  %v2960_v60 = vrot.slane %v2959_v56, 2 }
 0x52f   :  { %v2955_v61 = vadd.f32 %v2954_v21, %v2953_v22  ;;  %v2972_v62 = vrot.slane %v2971_v58, 2 }
 0x530   :  { %v2967_v63 = vadd.f32 %v2966_v59, %v2965_v53  ;;  %v2961_v38 = vadd.f32 %v2960_v60, %v2959_v56 }
 0x531   :  { %v2956_v39 = vrot.slane %v2955_v61, 1  ;;  %v2973_v40 = vadd.f32 %v2972_v62, %v2971_v58  ;;  %v3243_v62 = vrot.slane %v5006_v55, %v3242_v23 }
 0x532   :  { %v2968_v42 = vrot.slane %v2967_v63, 1  ;;  %v2962_v43 = vrot.slane %v2961_v38, 1 }
 0x533   :  { %v2957_v1 = vadd.f32 %v2956_v39, %v2955_v61  ;;  %v2974_v2 = vrot.slane %v2973_v40, 1 }
 0x534   :  { %v2969_v46 = vadd.f32 %v2968_v42, %v2967_v63  ;;  %v2963_v47 = vadd.f32 %v2962_v43, %v2961_v38 }
 0x535   :  { %v2980_v48 = vmul.f32 0.125, %v2957_v1  ;;  %v2975_v36 = vadd.f32 %v2974_v2, %v2973_v40 }
 0x536   :  { %v2982_v50 = vmul.f32 0.125, %v2969_v46  ;;  %v2981_v4 = vmul.f32 0.125, %v2963_v47 }
 0x537   :  { %v2988_v5 = vadd.f32 0.8, %v2980_v48  ;;  %v2983_v6 = vmul.f32 0.125, %v2975_v36 }
 0x538   :  { %v2990_v7 = vadd.f32 0.8, %v2982_v50  ;;  %v2989_v8 = vadd.f32 0.8, %v2981_v4 }
 0x539   :  { %4551 = vrsqrt.f32 %v2988_v5  ;;  %v2991_v51 = vadd.f32 0.8, %v2983_v6 }
 0x53a   :  { %4553 = vrsqrt.f32 %v2990_v7 }
 0x53b   :  { %4555 = vrsqrt.f32 %v2989_v8 }
 0x53c   :  { %4557 = vrsqrt.f32 %v2991_v51 }
 0x543   :  { %v4552_v13 = vpop.eup %4551 }
 0x544   :  { %v4554_v57 = vpop.eup %4553  ;;  %v3004_v52 = vmul.f32 %v4552_v13, %v2916_v37 }
 0x545   :  { %v4556_v24 = vpop.eup %4555  ;;  %v3006_v17 = vmul.f32 %v4554_v57, %v2918_v31 }
 0x546   :  { %v4558_v19 = vpop.eup %4557  ;;  %v3044_v25 = vmul.f32 %v3027_v11, %v3004_v52  ;;  %v3005_v27 = vmul.f32 %v4556_v24, %v2917_v32 }
 0x547   :  { %v3046_v30 = vmul.f32 %v3035_v14, %v3006_v17  ;;  %v3007_v33 = vmul.f32 %v4558_v19, %v2919_v34 }
 0x548   :  { %v3084_v37 = vadd.f32 %v3067_v15, %v3044_v25  ;;  %v3045_v20 = vmul.f32 %v3031_v16, %v3005_v27 }
 0x549   :  { %v3086_v28 = vadd.f32 %v3075_v3, %v3046_v30  ;;  %v3047_v41 = vmul.f32 %v3039_v18, %v3007_v33 }
 0x54a   :  { %v3085_v44 = vadd.f32 %v3071_v29, %v3045_v20  ;;  %v3092_v45 = vmul.f32 0.2, %v3084_v37 }
 0x54b   :  { %v3087_v31 = vadd.f32 %v3079_v35, %v3047_v41  ;;  %v3094_v22 = vmul.f32 0.2, %v3086_v28 }
 0x54c   :  { %v3093_v49 = vmul.f32 0.2, %v3085_v44  ;;  %v3100_v54 = vmax.f32 %v3084_v37, %v3092_v45 }
 0x54d   :  { %v3095_v53 = vmul.f32 0.2, %v3087_v31  ;;  %v3102_v21 = vmax.f32 %v3086_v28, %v3094_v22 }
 0x54e   :  { %v3101_v56 = vmax.f32 %v3085_v44, %v3093_v49  ;;  %v3108_v60 = vpack.c.bf16 %v3100_v54, %v3100_v54 }
 0x54f   :  { %v3103_v32 = vmax.f32 %v3087_v31, %v3095_v53  ;;  %v3110_v34 = vpack.c.bf16 %v3102_v21, %v3102_v21 }
 0x550   :  { %v3109_v58 = vpack.c.bf16 %v3101_v56, %v3101_v56 }
 0x551   :  { %v3111_v59 = vpack.c.bf16 %v3103_v32, %v3103_v32 }
 0x552   :  { %3740 = vmatprep.mubr.bf16.mxu0 %v3109_v58 }
 0x553   :  { %3780 = vmatprep.mubr.bf16.mxu1 %v3111_v59  ;;  %3741 = vmatmul.mubr.bf16.vlgmr.msra.gmra.mrb[20].mxu0 %v3108_v60 }
 0x554   :  { %3781 = vmatmul.mubr.bf16.vlgmr.msra.gmra.mrb[20].mxu1 %v3110_v34 }
 0x5a6   :  { %v4230_v61 = vpop.f32.mrb[16].mxu0 }
 0x5a7   :  { %v4252_v63 = vpop.f32.mrb[16].mxu1  ;;  %v4231_v38 = vpop.f32.mrb[17].mxu0 }
 0x5a8   :  { %v4232_v39 = vadd.f32 %v4231_v38, %v4230_v61  ;;  %v4253_v40 = vpop.f32.mrb[17].mxu1  ;;  %v4233_v42 = vpop.f32.mrb[18].mxu0 }
 0x5a9   :  { %v4254_v43 = vadd.f32 %v4253_v40, %v4252_v63  ;;  %v4255_v1 = vpop.f32.mrb[18].mxu1  ;;  %v4234_v2 = vpop.f32.mrb[19].mxu0 }
 0x5aa   :  { %v3663_v46 = vadd.f32 %v4232_v39, %v3243_v62  ;;  %v4256_v47 = vpop.f32.mrb[19].mxu1 }
 0x5ac   :  { %v3703_v48 = vadd.f32 %v4254_v43, %v3663_v46 }
 0x626   :  { %v4274_v36 = vpop.f32.mrb[20].mxu0 }
 0x627   :  { %v4296_v50 = vpop.f32.mrb[20].mxu1  ;;  %v4275_v4 = vpop.f32.mrb[21].mxu0 }
 0x628   :  { %v4276_v5 = vadd.f32 %v4275_v4, %v4274_v36  ;;  %v4297_v6 = vpop.f32.mrb[21].mxu1  ;;  %v4277_v26 = vpop.f32.mrb[22].mxu0 }
 0x629   :  { %v4298_v7 = vadd.f32 %v4297_v6, %v4296_v50  ;;  %v4299_v8 = vpop.f32.mrb[22].mxu1  ;;  %v4278_v55 = vpop.f32.mrb[23].mxu0 }
 0x62a   :  { %v3743_v51 = vadd.f32 %v4276_v5, %v3703_v48  ;;  %v4300_v9 = vpop.f32.mrb[23].mxu1 }
 0x62c   :  { %v3783_v0 = vadd.f32 %v4298_v7, %v3743_v51 }
 0x62e   :  { %4559 = vtanh.f32 %v3783_v0 }
 0x638   :  { %v4560_v10 = vpop.eup %4559 }
 0x639   :  { %3789 = vst [vmem:[#allocation14] sm:$0xff] %v4560_v10 }
 0x63a   :  { %4730 = shalt.err (!%p4727_p4)
}
 0x63b   :  { %s4731_s16 = scalar_lea.hbm %s5049_s7, 128 }
 0x63c   :  { %p4732_p5 = scmp.ne.s32.totalorder %s5049_s7, %s4731_s16  ;;  %p4735_p6 = scmp.lt.u32.totalorder %s4731_s16, %s5049_s7 }
 0x63e   :  { %p4737_p7 = pnand %p4735_p6, %p4732_p5 }
 0x640   :  { %4740 = shalt.err (!%p4737_p7)
}
 0x641   :  { %3799 = dma.vmem_to_hbm [thread:$0]  %s3797_s8, 128, %s5049_s7, [#allocation4]  }
 0x642   :  { %4749 = dma.done.wait [#allocation4], 128  }
 0x643   :  { %4750 = vsyncadd [#allocation4], 4294967168 }
 0x644   :  { %3803 = vsyncpa [#allocation3], 1 }
 0x645   :  { %3804 = vsyncpa [#allocation6], 1 }
 0x646   :  { %3805 = vsyncpa [#allocation9], 1 }
 0x647   :  { %3806 = vsyncpa [#allocation12], 1 }
 0x648   :  { %3807 = vsyncpa [#allocation4], 1 }

</bundles_post_ra>
